<compile_context>
chip_gen: v5e
topology: v5e:2x2
jax: 0.10.0
libtpu: 0.0.40
codegen_flags: <defaults>
</compile_context>

<pallas_src>
import numpy as np

import jax
import jax.numpy as jnp
from jax.experimental import pallas as pl
from jax.experimental.pallas import tpu as pltpu


# ---------------------------------------------------------------------------
# Fused kernel: whole network forward for one sample (grid axis = batch).
# ---------------------------------------------------------------------------
def fused_net_kernel(x_ref, m1_ref, r1_ref, b1_ref, m2_ref, r2_ref, b2_ref,
                     fw1_ref, fb1_ref, fw2_ref, fb2_ref, fw3_ref, fb3_ref,
                     out_ref, xrp_ref, a1p_ref, flat_ref):
    """Activation layout is [H, W*C] (channel fastest, in the lane dim).

    The structured matrices m1/m2 already contain the kw taps, the replicate
    column padding and the two *horizontal* pooling phases (output columns
    [0:140] = even conv column, [140:280] = odd conv column).  r1/r2 are 0/1
    row-selection matrices holding the two *vertical* pooling phases
    (rows [0:half] = even conv row, [half:] = odd conv row).  A conv stage is:
        Y = sum_kh  rows[kh : kh+H] @ M[kh]
        Z = R @ Y
        A = relu(max(4 quadrants of Z) + bias_row)
    """
    f32 = jnp.float32
    x = x_ref[...]                                        # [28, 28]

    # ---------------- conv1 + ReLU + 2x2 maxpool ----------------
    # Replicate ROW padding into scratch (column padding is folded into m1).
    xrp_ref[1:29, :] = x
    xrp_ref[0:1, :] = x[0:1, :]
    xrp_ref[29:30, :] = x[27:28, :]

    y1 = jnp.zeros((28, 280), f32)
    for kh in range(3):
        y1 = y1 + jnp.dot(xrp_ref[kh:kh + 28, :], m1_ref[kh],
                          preferred_element_type=f32)
    z1 = jnp.dot(r1_ref[...], y1, preferred_element_type=f32)        # [28, 280]
    a1 = jnp.maximum(jnp.maximum(z1[0:14, 0:140], z1[0:14, 140:280]),
                     jnp.maximum(z1[14:28, 0:140], z1[14:28, 140:280]))
    a1 = jnp.maximum(a1 + b1_ref[...], 0.0)                          # [14, 140]

    # ---------------- conv2 + ReLU + 2x2 maxpool ----------------
    a1p_ref[1:15, :] = a1
    a1p_ref[0:1, :] = a1[0:1, :]
    a1p_ref[15:16, :] = a1[13:14, :]

    y2 = jnp.zeros((14, 280), f32)
    for kh in range(3):
        y2 = y2 + jnp.dot(a1p_ref[kh:kh + 14, :], m2_ref[kh],
                          preferred_element_type=f32)
    z2 = jnp.dot(r2_ref[...], y2, preferred_element_type=f32)        # [14, 280]
    a2 = jnp.maximum(jnp.maximum(z2[0:7, 0:140], z2[0:7, 140:280]),
                     jnp.maximum(z2[7:14, 0:140], z2[7:14, 140:280]))
    a2 = jnp.maximum(a2 + b2_ref[...], 0.0)                          # [7, 140]

    # ------- flatten to [1, 980] (fc1 weights are pre-permuted to h,w,c) ----
    for h in range(7):
        flat_ref[0:1, 140 * h:140 * (h + 1)] = a2[h:h + 1, :]
    feat = flat_ref[...]                                             # [1, 980]

    # ---------------- fc1 -> fc2 -> fc3 ----------------
    h1 = jnp.maximum(jnp.dot(feat, fw1_ref[...], preferred_element_type=f32)
                     + fb1_ref[...], 0.0)
    h2 = jnp.maximum(jnp.dot(h1, fw2_ref[...], preferred_element_type=f32)
                     + fb2_ref[...], 0.0)
    out_ref[...] = (jnp.dot(h2, fw3_ref[...], preferred_element_type=f32)
                    + fb3_ref[...])


# ---------------------------------------------------------------------------
# One-time parameter preparation (hoisted out of the hot path).
# ---------------------------------------------------------------------------
def prepare_params(p):
    """Repack PyTorch-layout params into kernel-ready structured operands."""
    w1 = np.asarray(p["conv1_w"], np.float32)      # [10, 1, 3, 3]
    b1 = np.asarray(p["conv1_b"], np.float32)      # [10]
    w2 = np.asarray(p["conv2_w"], np.float32)      # [20, 10, 3, 3]
    b2 = np.asarray(p["conv2_b"], np.float32)      # [20]

    # conv1: input [28 rows, 28 cols] (Cin=1); output columns = dj*140 + wo*10 + c.
    M1 = np.zeros((3, 28, 280), np.float32)
    for kh in range(3):
        for kw in range(3):
            for dj in range(2):                    # horizontal pooling phase
                for wo in range(14):               # pooled output column
                    win = min(max(2 * wo + dj + kw - 1, 0), 27)   # replicate pad
                    M1[kh, win, dj * 140 + wo * 10:dj * 140 + wo * 10 + 10] += \
                        w1[:, 0, kh, kw]
    R1 = np.zeros((28, 28), np.float32)
    for ho in range(14):
        R1[ho, 2 * ho] = 1.0                       # vertical pooling phase 0
        R1[14 + ho, 2 * ho + 1] = 1.0              # vertical pooling phase 1
    b1row = np.tile(b1, 14)[None, :]               # [1, 140]

    # conv2: input layout [14 rows, w*10+cin]; output columns = dj*140 + wo*20 + co.
    M2 = np.zeros((3, 140, 280), np.float32)
    for kh in range(3):
        for kw in range(3):
            for dj in range(2):
                for wo in range(7):
                    win = min(max(2 * wo + dj + kw - 1, 0), 13)   # replicate pad
                    M2[kh, win * 10:win * 10 + 10,
                       dj * 140 + wo * 20:dj * 140 + wo * 20 + 20] += \
                        w2[:, :, kh, kw].T         # [cin, cout]
    R2 = np.zeros((14, 14), np.float32)
    for ho in range(7):
        R2[ho, 2 * ho] = 1.0
        R2[7 + ho, 2 * ho + 1] = 1.0
    b2row = np.tile(b2, 7)[None, :]                # [1, 140]

    # fc1: torch.flatten(NCHW) order is (c, h, w); kernel flattens as (h, w, c)
    # -> permute fc1's 980 input columns ONCE here (no runtime transpose).
    fw1 = np.asarray(p["fc1_w"], np.float32).reshape(100, 20, 7, 7)   # [o,c,h,w]
    fw1 = np.transpose(fw1, (2, 3, 1, 0)).reshape(980, 100)           # [(h,w,c), o]

    return {
        "M1": jnp.asarray(M1), "R1": jnp.asarray(R1), "b1": jnp.asarray(b1row),
        "M2": jnp.asarray(M2), "R2": jnp.asarray(R2), "b2": jnp.asarray(b2row),
        "fw1": jnp.asarray(fw1),
        "fb1": jnp.asarray(np.asarray(p["fc1_b"], np.float32)[None, :]),
        "fw2": jnp.asarray(np.asarray(p["fc2_w"], np.float32).T),
        "fb2": jnp.asarray(np.asarray(p["fc2_b"], np.float32)[None, :]),
        "fw3": jnp.asarray(np.asarray(p["fc3_w"], np.float32).T),
        "fb3": jnp.asarray(np.asarray(p["fc3_b"], np.float32)[None, :]),
    }


# ---------------------------------------------------------------------------
# Forward pass: a single pallas_call, grid over the batch.
# ---------------------------------------------------------------------------
@jax.jit
def net_forward(kp, x):
    """x: [B, 1, 28, 28] float32 (same external interface as the PyTorch Net)."""
    B = x.shape[0]
    x3 = x.astype(jnp.float32).reshape(B, 28, 28)      # C=1 -> drop channel dim
    full2 = lambda b: (0, 0)
    full3 = lambda b: (0, 0, 0)
    out = pl.pallas_call(
        fused_net_kernel,
        out_shape=jax.ShapeDtypeStruct((B, 1, 8), jnp.float32),
        grid_spec=pltpu.PrefetchScalarGridSpec(
            num_scalar_prefetch=0,
            grid=(B,),
            in_specs=[
                pl.BlockSpec((None, 28, 28), lambda b: (b, 0, 0)),   # image
                pl.BlockSpec((3, 28, 280), full3),                   # M1
                pl.BlockSpec((28, 28), full2),                       # R1
                pl.BlockSpec((1, 140), full2),                       # b1 row
                pl.BlockSpec((3, 140, 280), full3),                  # M2
                pl.BlockSpec((14, 14), full2),                       # R2
                pl.BlockSpec((1, 140), full2),                       # b2 row
                pl.BlockSpec((980, 100), full2),                     # fc1 W (permuted)
                pl.BlockSpec((1, 100), full2),                       # fc1 b
                pl.BlockSpec((100, 50), full2),                      # fc2 W
                pl.BlockSpec((1, 50), full2),                        # fc2 b
                pl.BlockSpec((50, 8), full2),                        # fc3 W
                pl.BlockSpec((1, 8), full2),                         # fc3 b
            ],
            out_specs=pl.BlockSpec((None, 1, 8), lambda b: (b, 0, 0)),
            scratch_shapes=[
                pltpu.VMEM((30, 28), jnp.float32),    # row-padded image
                pltpu.VMEM((16, 140), jnp.float32),   # row-padded conv1 activation
                pltpu.VMEM((1, 980), jnp.float32),    # flattened conv2 activation
            ],
        ),
        compiler_params=pltpu.CompilerParams(
            dimension_semantics=("parallel",)),
    )(x3, kp["M1"], kp["R1"], kp["b1"], kp["M2"], kp["R2"], kp["b2"],
      kp["fw1"], kp["fb1"], kp["fw2"], kp["fb2"], kp["fw3"], kp["fb3"])
    return out.reshape(B, 8)


# ---------------------------------------------------------------------------
# PyTorch-layout parameter init + pure-XLA reference (for the numeric check).
# ---------------------------------------------------------------------------
def init_params(key):
    """Deterministic init mimicking PyTorch default (uniform +-1/sqrt(fan_in))."""
    ks = jax.random.split(key, 10)

    def u(k, shape, fan_in):
        bound = 1.0 / jnp.sqrt(jnp.float32(fan_in))
        return jax.random.uniform(k, shape, jnp.float32, -bound, bound)

    return {
        "conv1_w": u(ks[0], (10, 1, 3, 3), 1 * 9),
        "conv1_b": u(ks[1], (10,), 1 * 9),
        "conv2_w": u(ks[2], (20, 10, 3, 3), 10 * 9),
        "conv2_b": u(ks[3], (20,), 10 * 9),
        "fc1_w":   u(ks[4], (100, 20 * 7 * 7), 20 * 7 * 7),
        "fc1_b":   u(ks[5], (100,), 20 * 7 * 7),
        "fc2_w":   u(ks[6], (50, 100), 100),
        "fc2_b":   u(ks[7], (50,), 100),
        "fc3_w":   u(ks[8], (8, 50), 50),
        "fc3_b":   u(ks[9], (8,), 50),
    }


def reference_forward(p, x):
    """Plain-XLA reference of the PyTorch forward (correctness check only)."""
    def conv_relu_pool(h, w, b):
        hp = jnp.pad(h, ((0, 0), (0, 0), (1, 1), (1, 1)), mode="edge")
        y = jax.lax.conv_general_dilated(
            hp, w, window_strides=(1, 1), padding="VALID",
            dimension_numbers=("NCHW", "OIHW", "NCHW"))
        y = jax.nn.relu(y + b[None, :, None, None])
        return jax.lax.reduce_window(y, -jnp.inf, jax.lax.max,
                                     (1, 1, 2, 2), (1, 1, 2, 2), "VALID")

    y = conv_relu_pool(x, p["conv1_w"], p["conv1_b"])
    y = conv_relu_pool(y, p["conv2_w"], p["conv2_b"])
    f = y.reshape(y.shape[0], -1)
    h = jax.nn.relu(f @ p["fc1_w"].T + p["fc1_b"])
    h = jax.nn.relu(h @ p["fc2_w"].T + p["fc2_b"])
    return h @ p["fc3_w"].T + p["fc3_b"]


if __name__ == "__main__":
    key = jax.random.PRNGKey(0)
    pkey, xkey = jax.random.split(key)
    params = init_params(pkey)          # PyTorch-layout parameters
    kparams = prepare_params(params)    # one-time kernel-ready repack
    # fc1 expects 20*7*7 features => 28x28 single-channel input (MNIST-like).
    x = jax.random.normal(xkey, (2, 1, 28, 28), dtype=jnp.float32)

    logits = net_forward(kparams, x)
    jax.block_until_ready(logits)
    assert logits.shape == (2, 8) and logits.dtype == jnp.float32

    # Numeric check against the plain-XLA reference of the PyTorch forward
    # (loose tolerance: TPU default matmul precision may use bf16 passes).
    ref = reference_forward(params, x)
    np.testing.assert_allclose(np.asarray(logits), np.asarray(ref),
                               rtol=5e-2, atol=5e-2)
    print("KERNEL_OK")
</pallas_src>

<mosaic_0001>
module attributes {stable_mosaic.version = 11 : i64} {
  func.func @fused_net_kernel(%arg0: i32, %arg1: memref<1x28x28xf32, #tpu.memory_space<vmem>>, %arg2: memref<3x28x280xf32, #tpu.memory_space<vmem>>, %arg3: memref<28x28xf32, #tpu.memory_space<vmem>>, %arg4: memref<1x140xf32, #tpu.memory_space<vmem>>, %arg5: memref<3x140x280xf32, #tpu.memory_space<vmem>>, %arg6: memref<14x14xf32, #tpu.memory_space<vmem>>, %arg7: memref<1x140xf32, #tpu.memory_space<vmem>>, %arg8: memref<980x100xf32, #tpu.memory_space<vmem>>, %arg9: memref<1x100xf32, #tpu.memory_space<vmem>>, %arg10: memref<100x50xf32, #tpu.memory_space<vmem>>, %arg11: memref<1x50xf32, #tpu.memory_space<vmem>>, %arg12: memref<50x8xf32, #tpu.memory_space<vmem>>, %arg13: memref<1x8xf32, #tpu.memory_space<vmem>>, %arg14: memref<1x1x8xf32, #tpu.memory_space<vmem>>, %arg15: memref<30x28xf32, #tpu.memory_space<vmem>>, %arg16: memref<16x140xf32, #tpu.memory_space<vmem>>, %arg17: memref<1x980xf32, #tpu.memory_space<vmem>>) attributes {dimension_semantics = [#tpu.dimension_semantics<parallel>], iteration_bounds = array<i64: 2>, scalar_prefetch = 0 : i64, scratch_operands = 3 : i64, tpu.core_type = #tpu.core_type<tc>, window_params = [{transform_indices = @transform_0, window_bounds = array<i64: 1, 28, 28>}, {pipeline_mode = #tpu.pipeline_mode<synchronous>, transform_indices = @transform_1, window_bounds = array<i64: 3, 28, 280>}, {pipeline_mode = #tpu.pipeline_mode<synchronous>, transform_indices = @transform_2, window_bounds = array<i64: 28, 28>}, {pipeline_mode = #tpu.pipeline_mode<synchronous>, transform_indices = @transform_3, window_bounds = array<i64: 1, 140>}, {pipeline_mode = #tpu.pipeline_mode<synchronous>, transform_indices = @transform_4, window_bounds = array<i64: 3, 140, 280>}, {pipeline_mode = #tpu.pipeline_mode<synchronous>, transform_indices = @transform_5, window_bounds = array<i64: 14, 14>}, {pipeline_mode = #tpu.pipeline_mode<synchronous>, transform_indices = @transform_6, window_bounds = array<i64: 1, 140>}, {pipeline_mode = #tpu.pipeline_mode<synchronous>, transform_indices = @transform_7, window_bounds = array<i64: 980, 100>}, {pipeline_mode = #tpu.pipeline_mode<synchronous>, transform_indices = @transform_8, window_bounds = array<i64: 1, 100>}, {pipeline_mode = #tpu.pipeline_mode<synchronous>, transform_indices = @transform_9, window_bounds = array<i64: 100, 50>}, {pipeline_mode = #tpu.pipeline_mode<synchronous>, transform_indices = @transform_10, window_bounds = array<i64: 1, 50>}, {pipeline_mode = #tpu.pipeline_mode<synchronous>, transform_indices = @transform_11, window_bounds = array<i64: 50, 8>}, {pipeline_mode = #tpu.pipeline_mode<synchronous>, transform_indices = @transform_12, window_bounds = array<i64: 1, 8>}, {transform_indices = @transform_13, window_bounds = array<i64: 1, 1, 8>}]} {
    %c0 = arith.constant 0 : index
    %c0_0 = arith.constant 0 : index
    %c0_1 = arith.constant 0 : index
    %0 = vector.load %arg1[%c0, %c0_0, %c0_1] : memref<1x28x28xf32, #tpu.memory_space<vmem>>, vector<1x28x28xf32>
    %1 = vector.shape_cast %0 : vector<1x28x28xf32> to vector<28x28xf32>
    %c1 = arith.constant 1 : index
    %c0_2 = arith.constant 0 : index
    %2 = vector.load %arg15[%c1, %c0_2] : memref<30x28xf32, #tpu.memory_space<vmem>>, vector<28x28xf32>
    tpu.vector_store %arg15[%c1, %c0_2], %1 {strides = array<i32>} : memref<30x28xf32, #tpu.memory_space<vmem>>, vector<28x28xf32>,
    %3 = vector.extract_strided_slice %1 {offsets = [0, 0], sizes = [1, 28], strides = [1, 1]} : vector<28x28xf32> to vector<1x28xf32>
    %c0_3 = arith.constant 0 : index
    %c0_4 = arith.constant 0 : index
    %4 = vector.load %arg15[%c0_3, %c0_4] : memref<30x28xf32, #tpu.memory_space<vmem>>, vector<1x28xf32>
    tpu.vector_store %arg15[%c0_3, %c0_4], %3 {strides = array<i32>} : memref<30x28xf32, #tpu.memory_space<vmem>>, vector<1x28xf32>,
    %5 = vector.extract_strided_slice %1 {offsets = [27, 0], sizes = [1, 28], strides = [1, 1]} : vector<28x28xf32> to vector<1x28xf32>
    %c29 = arith.constant 29 : index
    %c0_5 = arith.constant 0 : index
    %6 = vector.load %arg15[%c29, %c0_5] : memref<30x28xf32, #tpu.memory_space<vmem>>, vector<1x28xf32>
    tpu.vector_store %arg15[%c29, %c0_5], %5 {strides = array<i32>} : memref<30x28xf32, #tpu.memory_space<vmem>>, vector<1x28xf32>,
    %cst = arith.constant 0.000000e+00 : f32
    %7 = vector.broadcast %cst : f32 to vector<28x280xf32>
    %c0_6 = arith.constant 0 : index
    %c0_7 = arith.constant 0 : index
    %8 = vector.load %arg15[%c0_6, %c0_7] : memref<30x28xf32, #tpu.memory_space<vmem>>, vector<28x28xf32>
    %c0_8 = arith.constant 0 : index
    %c0_9 = arith.constant 0 : index
    %c0_10 = arith.constant 0 : index
    %9 = vector.load %arg2[%c0_8, %c0_9, %c0_10] : memref<3x28x280xf32, #tpu.memory_space<vmem>>, vector<1x28x280xf32>
    %10 = vector.shape_cast %9 : vector<1x28x280xf32> to vector<28x280xf32>
    %cst_11 = arith.constant dense<0.000000e+00> : vector<28x280xf32>
    %11 = tpu.matmul %8, %10, %cst_11 {dimension_numbers = #tpu.dot_dimension_numbers<[1], [0], [0], [1], [0, 0, 1, 1], [], []>} : vector<28x28xf32>, vector<28x280xf32>, vector<28x280xf32> -> vector<28x280xf32>
    %12 = arith.addf %7, %11 : vector<28x280xf32>
    %c1_12 = arith.constant 1 : index
    %c0_13 = arith.constant 0 : index
    %13 = vector.load %arg15[%c1_12, %c0_13] : memref<30x28xf32, #tpu.memory_space<vmem>>, vector<28x28xf32>
    %c1_14 = arith.constant 1 : index
    %c0_15 = arith.constant 0 : index
    %c0_16 = arith.constant 0 : index
    %14 = vector.load %arg2[%c1_14, %c0_15, %c0_16] : memref<3x28x280xf32, #tpu.memory_space<vmem>>, vector<1x28x280xf32>
    %15 = vector.shape_cast %14 : vector<1x28x280xf32> to vector<28x280xf32>
    %cst_17 = arith.constant dense<0.000000e+00> : vector<28x280xf32>
    %16 = tpu.matmul %13, %15, %cst_17 {dimension_numbers = #tpu.dot_dimension_numbers<[1], [0], [0], [1], [0, 0, 1, 1], [], []>} : vector<28x28xf32>, vector<28x280xf32>, vector<28x280xf32> -> vector<28x280xf32>
    %17 = arith.addf %12, %16 : vector<28x280xf32>
    %c2 = arith.constant 2 : index
    %c0_18 = arith.constant 0 : index
    %18 = vector.load %arg15[%c2, %c0_18] : memref<30x28xf32, #tpu.memory_space<vmem>>, vector<28x28xf32>
    %c2_19 = arith.constant 2 : index
    %c0_20 = arith.constant 0 : index
    %c0_21 = arith.constant 0 : index
    %19 = vector.load %arg2[%c2_19, %c0_20, %c0_21] : memref<3x28x280xf32, #tpu.memory_space<vmem>>, vector<1x28x280xf32>
    %20 = vector.shape_cast %19 : vector<1x28x280xf32> to vector<28x280xf32>
    %cst_22 = arith.constant dense<0.000000e+00> : vector<28x280xf32>
    %21 = tpu.matmul %18, %20, %cst_22 {dimension_numbers = #tpu.dot_dimension_numbers<[1], [0], [0], [1], [0, 0, 1, 1], [], []>} : vector<28x28xf32>, vector<28x280xf32>, vector<28x280xf32> -> vector<28x280xf32>
    %22 = arith.addf %17, %21 : vector<28x280xf32>
    %c0_23 = arith.constant 0 : index
    %c0_24 = arith.constant 0 : index
    %23 = vector.load %arg3[%c0_23, %c0_24] : memref<28x28xf32, #tpu.memory_space<vmem>>, vector<28x28xf32>
    %cst_25 = arith.constant dense<0.000000e+00> : vector<28x280xf32>
    %24 = tpu.matmul %23, %22, %cst_25 {dimension_numbers = #tpu.dot_dimension_numbers<[1], [0], [0], [1], [0, 0, 1, 1], [], []>} : vector<28x28xf32>, vector<28x280xf32>, vector<28x280xf32> -> vector<28x280xf32>
    %25 = vector.extract_strided_slice %24 {offsets = [0, 0], sizes = [14, 140], strides = [1, 1]} : vector<28x280xf32> to vector<14x140xf32>
    %26 = vector.extract_strided_slice %24 {offsets = [0, 140], sizes = [14, 140], strides = [1, 1]} : vector<28x280xf32> to vector<14x140xf32>
    %27 = arith.maximumf %25, %26 : vector<14x140xf32>
    %28 = vector.extract_strided_slice %24 {offsets = [14, 0], sizes = [14, 140], strides = [1, 1]} : vector<28x280xf32> to vector<14x140xf32>
    %29 = vector.extract_strided_slice %24 {offsets = [14, 140], sizes = [14, 140], strides = [1, 1]} : vector<28x280xf32> to vector<14x140xf32>
    %30 = arith.maximumf %28, %29 : vector<14x140xf32>
    %31 = arith.maximumf %27, %30 : vector<14x140xf32>
    %c0_26 = arith.constant 0 : index
    %c0_27 = arith.constant 0 : index
    %32 = vector.load %arg4[%c0_26, %c0_27] : memref<1x140xf32, #tpu.memory_space<vmem>>, vector<1x140xf32>
    %33 = vector.broadcast %32 : vector<1x140xf32> to vector<14x140xf32>
    %34 = arith.addf %31, %33 : vector<14x140xf32>
    %cst_28 = arith.constant 0.000000e+00 : f32
    %35 = vector.broadcast %cst_28 : f32 to vector<14x140xf32>
    %36 = arith.maximumf %34, %35 : vector<14x140xf32>
    %c1_29 = arith.constant 1 : index
    %c0_30 = arith.constant 0 : index
    %37 = vector.load %arg16[%c1_29, %c0_30] : memref<16x140xf32, #tpu.memory_space<vmem>>, vector<14x140xf32>
    tpu.vector_store %arg16[%c1_29, %c0_30], %36 {strides = array<i32>} : memref<16x140xf32, #tpu.memory_space<vmem>>, vector<14x140xf32>,
    %38 = vector.extract_strided_slice %36 {offsets = [0, 0], sizes = [1, 140], strides = [1, 1]} : vector<14x140xf32> to vector<1x140xf32>
    %c0_31 = arith.constant 0 : index
    %c0_32 = arith.constant 0 : index
    %39 = vector.load %arg16[%c0_31, %c0_32] : memref<16x140xf32, #tpu.memory_space<vmem>>, vector<1x140xf32>
    tpu.vector_store %arg16[%c0_31, %c0_32], %38 {strides = array<i32>} : memref<16x140xf32, #tpu.memory_space<vmem>>, vector<1x140xf32>,
    %40 = vector.extract_strided_slice %36 {offsets = [13, 0], sizes = [1, 140], strides = [1, 1]} : vector<14x140xf32> to vector<1x140xf32>
    %c15 = arith.constant 15 : index
    %c0_33 = arith.constant 0 : index
    %41 = vector.load %arg16[%c15, %c0_33] : memref<16x140xf32, #tpu.memory_space<vmem>>, vector<1x140xf32>
    tpu.vector_store %arg16[%c15, %c0_33], %40 {strides = array<i32>} : memref<16x140xf32, #tpu.memory_space<vmem>>, vector<1x140xf32>,
    %cst_34 = arith.constant 0.000000e+00 : f32
    %42 = vector.broadcast %cst_34 : f32 to vector<14x280xf32>
    %c0_35 = arith.constant 0 : index
    %c0_36 = arith.constant 0 : index
    %43 = vector.load %arg16[%c0_35, %c0_36] : memref<16x140xf32, #tpu.memory_space<vmem>>, vector<14x140xf32>
    %c0_37 = arith.constant 0 : index
    %c0_38 = arith.constant 0 : index
    %c0_39 = arith.constant 0 : index
    %44 = vector.load %arg5[%c0_37, %c0_38, %c0_39] : memref<3x140x280xf32, #tpu.memory_space<vmem>>, vector<1x140x280xf32>
    %45 = vector.shape_cast %44 : vector<1x140x280xf32> to vector<140x280xf32>
    %cst_40 = arith.constant dense<0.000000e+00> : vector<14x280xf32>
    %46 = tpu.matmul %43, %45, %cst_40 {dimension_numbers = #tpu.dot_dimension_numbers<[1], [0], [0], [1], [0, 0, 1, 1], [], []>} : vector<14x140xf32>, vector<140x280xf32>, vector<14x280xf32> -> vector<14x280xf32>
    %47 = arith.addf %42, %46 : vector<14x280xf32>
    %c1_41 = arith.constant 1 : index
    %c0_42 = arith.constant 0 : index
    %48 = vector.load %arg16[%c1_41, %c0_42] : memref<16x140xf32, #tpu.memory_space<vmem>>, vector<14x140xf32>
    %c1_43 = arith.constant 1 : index
    %c0_44 = arith.constant 0 : index
    %c0_45 = arith.constant 0 : index
    %49 = vector.load %arg5[%c1_43, %c0_44, %c0_45] : memref<3x140x280xf32, #tpu.memory_space<vmem>>, vector<1x140x280xf32>
    %50 = vector.shape_cast %49 : vector<1x140x280xf32> to vector<140x280xf32>
    %cst_46 = arith.constant dense<0.000000e+00> : vector<14x280xf32>
    %51 = tpu.matmul %48, %50, %cst_46 {dimension_numbers = #tpu.dot_dimension_numbers<[1], [0], [0], [1], [0, 0, 1, 1], [], []>} : vector<14x140xf32>, vector<140x280xf32>, vector<14x280xf32> -> vector<14x280xf32>
    %52 = arith.addf %47, %51 : vector<14x280xf32>
    %c2_47 = arith.constant 2 : index
    %c0_48 = arith.constant 0 : index
    %53 = vector.load %arg16[%c2_47, %c0_48] : memref<16x140xf32, #tpu.memory_space<vmem>>, vector<14x140xf32>
    %c2_49 = arith.constant 2 : index
    %c0_50 = arith.constant 0 : index
    %c0_51 = arith.constant 0 : index
    %54 = vector.load %arg5[%c2_49, %c0_50, %c0_51] : memref<3x140x280xf32, #tpu.memory_space<vmem>>, vector<1x140x280xf32>
    %55 = vector.shape_cast %54 : vector<1x140x280xf32> to vector<140x280xf32>
    %cst_52 = arith.constant dense<0.000000e+00> : vector<14x280xf32>
    %56 = tpu.matmul %53, %55, %cst_52 {dimension_numbers = #tpu.dot_dimension_numbers<[1], [0], [0], [1], [0, 0, 1, 1], [], []>} : vector<14x140xf32>, vector<140x280xf32>, vector<14x280xf32> -> vector<14x280xf32>
    %57 = arith.addf %52, %56 : vector<14x280xf32>
    %c0_53 = arith.constant 0 : index
    %c0_54 = arith.constant 0 : index
    %58 = vector.load %arg6[%c0_53, %c0_54] : memref<14x14xf32, #tpu.memory_space<vmem>>, vector<14x14xf32>
    %cst_55 = arith.constant dense<0.000000e+00> : vector<14x280xf32>
    %59 = tpu.matmul %58, %57, %cst_55 {dimension_numbers = #tpu.dot_dimension_numbers<[1], [0], [0], [1], [0, 0, 1, 1], [], []>} : vector<14x14xf32>, vector<14x280xf32>, vector<14x280xf32> -> vector<14x280xf32>
    %60 = vector.extract_strided_slice %59 {offsets = [0, 0], sizes = [7, 140], strides = [1, 1]} : vector<14x280xf32> to vector<7x140xf32>
    %61 = vector.extract_strided_slice %59 {offsets = [0, 140], sizes = [7, 140], strides = [1, 1]} : vector<14x280xf32> to vector<7x140xf32>
    %62 = arith.maximumf %60, %61 : vector<7x140xf32>
    %63 = vector.extract_strided_slice %59 {offsets = [7, 0], sizes = [7, 140], strides = [1, 1]} : vector<14x280xf32> to vector<7x140xf32>
    %64 = vector.extract_strided_slice %59 {offsets = [7, 140], sizes = [7, 140], strides = [1, 1]} : vector<14x280xf32> to vector<7x140xf32>
    %65 = arith.maximumf %63, %64 : vector<7x140xf32>
    %66 = arith.maximumf %62, %65 : vector<7x140xf32>
    %c0_56 = arith.constant 0 : index
    %c0_57 = arith.constant 0 : index
    %67 = vector.load %arg7[%c0_56, %c0_57] : memref<1x140xf32, #tpu.memory_space<vmem>>, vector<1x140xf32>
    %68 = vector.broadcast %67 : vector<1x140xf32> to vector<7x140xf32>
    %69 = arith.addf %66, %68 : vector<7x140xf32>
    %cst_58 = arith.constant 0.000000e+00 : f32
    %70 = vector.broadcast %cst_58 : f32 to vector<7x140xf32>
    %71 = arith.maximumf %69, %70 : vector<7x140xf32>
    %72 = vector.extract_strided_slice %71 {offsets = [0, 0], sizes = [1, 140], strides = [1, 1]} : vector<7x140xf32> to vector<1x140xf32>
    %c0_59 = arith.constant 0 : index
    %c0_60 = arith.constant 0 : index
    %73 = vector.load %arg17[%c0_59, %c0_60] : memref<1x980xf32, #tpu.memory_space<vmem>>, vector<1x140xf32>
    tpu.vector_store %arg17[%c0_59, %c0_60], %72 {strides = array<i32>} : memref<1x980xf32, #tpu.memory_space<vmem>>, vector<1x140xf32>,
    %74 = vector.extract_strided_slice %71 {offsets = [1, 0], sizes = [1, 140], strides = [1, 1]} : vector<7x140xf32> to vector<1x140xf32>
    %c0_61 = arith.constant 0 : index
    %c140 = arith.constant 140 : index
    %75 = vector.load %arg17[%c0_61, %c140] : memref<1x980xf32, #tpu.memory_space<vmem>>, vector<1x140xf32>
    tpu.vector_store %arg17[%c0_61, %c140], %74 {strides = array<i32>} : memref<1x980xf32, #tpu.memory_space<vmem>>, vector<1x140xf32>,
    %76 = vector.extract_strided_slice %71 {offsets = [2, 0], sizes = [1, 140], strides = [1, 1]} : vector<7x140xf32> to vector<1x140xf32>
    %c0_62 = arith.constant 0 : index
    %c280 = arith.constant 280 : index
    %77 = vector.load %arg17[%c0_62, %c280] : memref<1x980xf32, #tpu.memory_space<vmem>>, vector<1x140xf32>
    tpu.vector_store %arg17[%c0_62, %c280], %76 {strides = array<i32>} : memref<1x980xf32, #tpu.memory_space<vmem>>, vector<1x140xf32>,
    %78 = vector.extract_strided_slice %71 {offsets = [3, 0], sizes = [1, 140], strides = [1, 1]} : vector<7x140xf32> to vector<1x140xf32>
    %c0_63 = arith.constant 0 : index
    %c420 = arith.constant 420 : index
    %79 = vector.load %arg17[%c0_63, %c420] : memref<1x980xf32, #tpu.memory_space<vmem>>, vector<1x140xf32>
    tpu.vector_store %arg17[%c0_63, %c420], %78 {strides = array<i32>} : memref<1x980xf32, #tpu.memory_space<vmem>>, vector<1x140xf32>,
    %80 = vector.extract_strided_slice %71 {offsets = [4, 0], sizes = [1, 140], strides = [1, 1]} : vector<7x140xf32> to vector<1x140xf32>
    %c0_64 = arith.constant 0 : index
    %c560 = arith.constant 560 : index
    %81 = vector.load %arg17[%c0_64, %c560] : memref<1x980xf32, #tpu.memory_space<vmem>>, vector<1x140xf32>
    tpu.vector_store %arg17[%c0_64, %c560], %80 {strides = array<i32>} : memref<1x980xf32, #tpu.memory_space<vmem>>, vector<1x140xf32>,
    %82 = vector.extract_strided_slice %71 {offsets = [5, 0], sizes = [1, 140], strides = [1, 1]} : vector<7x140xf32> to vector<1x140xf32>
    %c0_65 = arith.constant 0 : index
    %c700 = arith.constant 700 : index
    %83 = vector.load %arg17[%c0_65, %c700] : memref<1x980xf32, #tpu.memory_space<vmem>>, vector<1x140xf32>
    tpu.vector_store %arg17[%c0_65, %c700], %82 {strides = array<i32>} : memref<1x980xf32, #tpu.memory_space<vmem>>, vector<1x140xf32>,
    %84 = vector.extract_strided_slice %71 {offsets = [6, 0], sizes = [1, 140], strides = [1, 1]} : vector<7x140xf32> to vector<1x140xf32>
    %c0_66 = arith.constant 0 : index
    %c840 = arith.constant 840 : index
    %85 = vector.load %arg17[%c0_66, %c840] : memref<1x980xf32, #tpu.memory_space<vmem>>, vector<1x140xf32>
    tpu.vector_store %arg17[%c0_66, %c840], %84 {strides = array<i32>} : memref<1x980xf32, #tpu.memory_space<vmem>>, vector<1x140xf32>,
    %c0_67 = arith.constant 0 : index
    %c0_68 = arith.constant 0 : index
    %86 = vector.load %arg17[%c0_67, %c0_68] : memref<1x980xf32, #tpu.memory_space<vmem>>, vector<1x980xf32>
    %c0_69 = arith.constant 0 : index
    %c0_70 = arith.constant 0 : index
    %87 = vector.load %arg8[%c0_69, %c0_70] : memref<980x100xf32, #tpu.memory_space<vmem>>, vector<980x100xf32>
    %cst_71 = arith.constant dense<0.000000e+00> : vector<1x100xf32>
    %88 = tpu.matmul %86, %87, %cst_71 {dimension_numbers = #tpu.dot_dimension_numbers<[1], [0], [0], [1], [0, 0, 1, 1], [], []>} : vector<1x980xf32>, vector<980x100xf32>, vector<1x100xf32> -> vector<1x100xf32>
    %c0_72 = arith.constant 0 : index
    %c0_73 = arith.constant 0 : index
    %89 = vector.load %arg9[%c0_72, %c0_73] : memref<1x100xf32, #tpu.memory_space<vmem>>, vector<1x100xf32>
    %90 = arith.addf %88, %89 : vector<1x100xf32>
    %cst_74 = arith.constant 0.000000e+00 : f32
    %91 = vector.broadcast %cst_74 : f32 to vector<1x100xf32>
    %92 = arith.maximumf %90, %91 : vector<1x100xf32>
    %c0_75 = arith.constant 0 : index
    %c0_76 = arith.constant 0 : index
    %93 = vector.load %arg10[%c0_75, %c0_76] : memref<100x50xf32, #tpu.memory_space<vmem>>, vector<100x50xf32>
    %cst_77 = arith.constant dense<0.000000e+00> : vector<1x50xf32>
    %94 = tpu.matmul %92, %93, %cst_77 {dimension_numbers = #tpu.dot_dimension_numbers<[1], [0], [0], [1], [0, 0, 1, 1], [], []>} : vector<1x100xf32>, vector<100x50xf32>, vector<1x50xf32> -> vector<1x50xf32>
    %c0_78 = arith.constant 0 : index
    %c0_79 = arith.constant 0 : index
    %95 = vector.load %arg11[%c0_78, %c0_79] : memref<1x50xf32, #tpu.memory_space<vmem>>, vector<1x50xf32>
    %96 = arith.addf %94, %95 : vector<1x50xf32>
    %cst_80 = arith.constant 0.000000e+00 : f32
    %97 = vector.broadcast %cst_80 : f32 to vector<1x50xf32>
    %98 = arith.maximumf %96, %97 : vector<1x50xf32>
    %c0_81 = arith.constant 0 : index
    %c0_82 = arith.constant 0 : index
    %99 = vector.load %arg12[%c0_81, %c0_82] : memref<50x8xf32, #tpu.memory_space<vmem>>, vector<50x8xf32>
    %cst_83 = arith.constant dense<0.000000e+00> : vector<1x8xf32>
    %100 = tpu.matmul %98, %99, %cst_83 {dimension_numbers = #tpu.dot_dimension_numbers<[1], [0], [0], [1], [0, 0, 1, 1], [], []>} : vector<1x50xf32>, vector<50x8xf32>, vector<1x8xf32> -> vector<1x8xf32>
    %c0_84 = arith.constant 0 : index
    %c0_85 = arith.constant 0 : index
    %101 = vector.load %arg13[%c0_84, %c0_85] : memref<1x8xf32, #tpu.memory_space<vmem>>, vector<1x8xf32>
    %102 = arith.addf %100, %101 : vector<1x8xf32>
    %c0_86 = arith.constant 0 : index
    %c0_87 = arith.constant 0 : index
    %c0_88 = arith.constant 0 : index
    %103 = vector.load %arg14[%c0_86, %c0_87, %c0_88] : memref<1x1x8xf32, #tpu.memory_space<vmem>>, vector<1x1x8xf32>
    %104 = vector.shape_cast %103 : vector<1x1x8xf32> to vector<1x8xf32>
    %105 = vector.shape_cast %102 : vector<1x8xf32> to vector<1x1x8xf32>
    tpu.vector_store %arg14[%c0_86, %c0_87, %c0_88], %105 {strides = array<i32>} : memref<1x1x8xf32, #tpu.memory_space<vmem>>, vector<1x1x8xf32>,
    return
  }
  func.func @transform_0(%arg0: i32) -> (i32, i32, i32) {
    %c0_i32 = arith.constant 0 : i32
    %c0_i32_0 = arith.constant 0 : i32
    %c0_i32_1 = arith.constant 0 : i32
    return %arg0, %c0_i32, %c0_i32_0 : i32, i32, i32
  }
  func.func @transform_1(%arg0: i32) -> (i32, i32, i32) {
    %c0_i32 = arith.constant 0 : i32
    %c0_i32_0 = arith.constant 0 : i32
    %c0_i32_1 = arith.constant 0 : i32
    %c0_i32_2 = arith.constant 0 : i32
    return %c0_i32, %c0_i32_0, %c0_i32_1 : i32, i32, i32
  }
  func.func @transform_2(%arg0: i32) -> (i32, i32) {
    %c0_i32 = arith.constant 0 : i32
    %c0_i32_0 = arith.constant 0 : i32
    %c0_i32_1 = arith.constant 0 : i32
    return %c0_i32, %c0_i32_0 : i32, i32
  }
  func.func @transform_3(%arg0: i32) -> (i32, i32) {
    %c0_i32 = arith.constant 0 : i32
    %c0_i32_0 = arith.constant 0 : i32
    %c0_i32_1 = arith.constant 0 : i32
    return %c0_i32, %c0_i32_0 : i32, i32
  }
  func.func @transform_4(%arg0: i32) -> (i32, i32, i32) {
    %c0_i32 = arith.constant 0 : i32
    %c0_i32_0 = arith.constant 0 : i32
    %c0_i32_1 = arith.constant 0 : i32
    %c0_i32_2 = arith.constant 0 : i32
    return %c0_i32, %c0_i32_0, %c0_i32_1 : i32, i32, i32
  }
  func.func @transform_5(%arg0: i32) -> (i32, i32) {
    %c0_i32 = arith.constant 0 : i32
    %c0_i32_0 = arith.constant 0 : i32
    %c0_i32_1 = arith.constant 0 : i32
    return %c0_i32, %c0_i32_0 : i32, i32
  }
  func.func @transform_6(%arg0: i32) -> (i32, i32) {
    %c0_i32 = arith.constant 0 : i32
    %c0_i32_0 = arith.constant 0 : i32
    %c0_i32_1 = arith.constant 0 : i32
    return %c0_i32, %c0_i32_0 : i32, i32
  }
  func.func @transform_7(%arg0: i32) -> (i32, i32) {
    %c0_i32 = arith.constant 0 : i32
    %c0_i32_0 = arith.constant 0 : i32
    %c0_i32_1 = arith.constant 0 : i32
    return %c0_i32, %c0_i32_0 : i32, i32
  }
  func.func @transform_8(%arg0: i32) -> (i32, i32) {
    %c0_i32 = arith.constant 0 : i32
    %c0_i32_0 = arith.constant 0 : i32
    %c0_i32_1 = arith.constant 0 : i32
    return %c0_i32, %c0_i32_0 : i32, i32
  }
  func.func @transform_9(%arg0: i32) -> (i32, i32) {
    %c0_i32 = arith.constant 0 : i32
    %c0_i32_0 = arith.constant 0 : i32
    %c0_i32_1 = arith.constant 0 : i32
    return %c0_i32, %c0_i32_0 : i32, i32
  }
  func.func @transform_10(%arg0: i32) -> (i32, i32) {
    %c0_i32 = arith.constant 0 : i32
    %c0_i32_0 = arith.constant 0 : i32
    %c0_i32_1 = arith.constant 0 : i32
    return %c0_i32, %c0_i32_0 : i32, i32
  }
  func.func @transform_11(%arg0: i32) -> (i32, i32) {
    %c0_i32 = arith.constant 0 : i32
    %c0_i32_0 = arith.constant 0 : i32
    %c0_i32_1 = arith.constant 0 : i32
    return %c0_i32, %c0_i32_0 : i32, i32
  }
  func.func @transform_12(%arg0: i32) -> (i32, i32) {
    %c0_i32 = arith.constant 0 : i32
    %c0_i32_0 = arith.constant 0 : i32
    %c0_i32_1 = arith.constant 0 : i32
    return %c0_i32, %c0_i32_0 : i32, i32
  }
  func.func @transform_13(%arg0: i32) -> (i32, i32, i32) {
    %c0_i32 = arith.constant 0 : i32
    %c0_i32_0 = arith.constant 0 : i32
    %c0_i32_1 = arith.constant 0 : i32
    return %arg0, %c0_i32, %c0_i32_0 : i32, i32, i32
  }
}

</mosaic_0001>

<bundles_post_ra>
// kernel: net_forward.1
= control target key start
LH: loop header
LB: loop body
LE: loop exit
PB: predicated region body
PF: predicated region fallthrough
CT: control target
= control target key end

     0   :  { %s4288_s0 = inlined_call_operand.vmem [shape: f32[2,28,28], index: 0, kind: input, shape index: {}]   ;;  %s4289_s1 = inlined_call_operand.vmem [shape: f32[3,28,280], index: 1, kind: input, shape index: {}]   ;;  %s4290_s2 = inlined_call_operand.vmem [shape: f32[28,28], index: 2, kind: input, shape index: {}]   ;;  %s4291_s3 = inlined_call_operand.vmem [shape: f32[1,140], index: 3, kind: input, shape index: {}]   ;;  %s4292_s4 = inlined_call_operand.vmem [shape: f32[3,140,280], index: 4, kind: input, shape index: {}]   ;;  %s4293_s5 = inlined_call_operand.vmem [shape: f32[14,14], index: 5, kind: input, shape index: {}]   ;;  %s4294_s6 = inlined_call_operand.vmem [shape: f32[1,140], index: 6, kind: input, shape index: {}]   ;;  %s4295_s7 = inlined_call_operand.vmem [shape: f32[980,100], index: 7, kind: input, shape index: {}]   ;;  %s4296_s8 = inlined_call_operand.vmem [shape: f32[1,100], index: 8, kind: input, shape index: {}]   ;;  %s4297_s9 = inlined_call_operand.vmem [shape: f32[100,50], index: 9, kind: input, shape index: {}]   ;;  %s4298_s10 = inlined_call_operand.vmem [shape: f32[1,50], index: 10, kind: input, shape index: {}]   ;;  %s4299_s11 = inlined_call_operand.vmem [shape: f32[50,8], index: 11, kind: input, shape index: {}]   ;;  %s4300_s12 = inlined_call_operand.vmem [shape: f32[1,8], index: 12, kind: input, shape index: {}]   ;;  %s4301_s13 = inlined_call_operand.hbm [shape: f32[2,1,8], index: 13, kind: output, shape index: {}]  }
   0x1   :  { %4305 = sst [smem:[#allocation11_spill]] %s4288_s0 }
   0x2   :  { %18 = vsyncpa [#allocation6], 0 }
   0x3   :  { %20 = vsyncpa [#allocation6 + $0x1], 0  ;;  %s2849_s25 = smov 0   ;;  %s2851_s26 = smov 0  }
   0x4   :  { %s2853_s27 = smov 0   ;;  %s2855_s28 = smov 0  }
   0x5 LB: > { %4306 = sst [smem:[#allocation8_spill]] %s2766_s27  ;;  %s2870_s29 = sadd.s32 4294967295, %s2770_s28   ;;  %s2770_s28 = sphi %s2855_s28, %s4330_s28   ;;  %s2766_s27 = sphi %s2853_s27, %s4332_s27   ;;  %s2762_s26 = sphi %s2851_s26, %s4334_s26   ;;  %s2758_s25 = sphi %s2849_s25, %s4333_s25  }
   0x6   : > { %s2413_s30 = sadd.s32 4294967294, %s2770_s28   ;;  %s2874_s14 = sadd.s32 1, %s2770_s28  }
   0x7   : > { %4307 = sst [smem:[#allocation9_spill]] %s2874_s14  ;;  %s311_s15 = sadd.s32 1, %s2766_s27 }
   0x8   : > { %s308_s16 = ssub.s32 %s2770_s28, %s2874_s14  ;;  %p321_p0 = scmp.ne.s32.totalorder %s2766_s27, %s2762_s26 }
   0x9   : > { %p309_p1 = scmp.eq.s32.totalorder %s308_s16, 0  ;;  %p322_p2 = scmp.eq.s32.totalorder %s2870_s29, 1 }
   0xa   : > { %p327_p3 = scmp.ne.s32.totalorder %s2762_s26, %s2758_s25  ;;  %p328_p4 = scmp.eq.s32.totalorder %s2413_s30, 1 }
   0xb   : > { %s2885_s17 = scalar_select %p309_p1, %s2766_s27, %s311_s15  }
   0xc   : > { %p2887_p5 = por %p322_p2, %p321_p0  ;;  %p2891_p6 = por %p328_p4, %p327_p3 }
   0xd   : > { %4308 = sst [smem:[#allocation10_spill]] %s2885_s17  ;;  %p2416_p7 = scmp.ge.s32.totalorder %s2770_s28, 1 }
   0xe   : > { %p390_p8 = scmp.lt.s32.totalorder %s2770_s28, 3 }
  0x10   : > { %p391_p9 = pnand %p2416_p7, %p390_p8 }
  0x11   : > { %p433_p10 = scmp.lt.s32.totalorder (!%p391_p9), %s2870_s29, 1  ;;  %s4311_s0 = sld [smem:[#allocation11_spill]] (!%p391_p9) }
  0x12   : > { %394 = sbr.rel (%p391_p9) target bundleno = 1636 (0x664), region = 72  ;;  %s2772_s21 = smov (!%p391_p9), 116  }
  0x13   : > { %s2774_s27 = smov (!%p391_p9), 24   ;;  %s2775_s24 = smov (!%p391_p9), 36  }
  0x14   : > { %s2776_s30 = smov (!%p391_p9), 48   ;;  %s2777_s15 = smov (!%p391_p9), 60  }
  0x17   : > { %v2428_v0 = vld [vmem:[%s4289_s1 + $0xa8] sm:$0xf]  ;;  %vm497_vm0 = vcmask 1043456   ;;  %v2429_v1 = vld [vmem:[%s4289_s1 + $0xb0] sm:$0xf]  ;;  %v2426_v4 = vld [vmem:[%s4289_s1 + $0x98] sm:$0xff] }
  0x18   : > { %v2425_v2 = vld [vmem:[%s4289_s1 + $0x90] sm:$0xff]  ;;  %2431 = vmatpush.msk.msra.mxu0 %vm497_vm0, %v2428_v0  ;;  %2436 = vmatpush.msk.msra.mxu1 %vm497_vm0, %v2429_v1  ;;  %v2430_v3 = vld [vmem:[%s4289_s1 + $0xb8] sm:$0xf]  ;;  %v2427_v5 = vld [vmem:[%s4289_s1 + $0xa0] sm:$0xff]  ;;  %s434_s23 = scalar_select %p433_p10, %s2870_s29, 1  ;;  %vm442_vm1 = vcmask 228352  }
  0x19   : > { %2441 = vmatpush.msk.msra.mxu2 %vm497_vm0, %v2430_v3  ;;  %v465_v6 = vld [vmem:[%s4289_s1 + $0x48] sm:$0xf]  ;;  %v2422_v7 = vld [vmem:[%s4289_s1 + $0x78] sm:$0xff]  ;;  %v2423_v8 = vld [vmem:[%s4289_s1 + $0x80] sm:$0xff]  ;;  %vm446_vm2 = vcmask 224256   ;;  %vm448_vm3 = vcmask 221184  }
  0x1a   : > { %520 = vmatpush.msra.mxu0 %v2425_v2  ;;  %549 = vmatpush.msra.mxu1 %v2426_v4  ;;  %v2424_v9 = vld [vmem:[%s4289_s1 + $0x88] sm:$0xff]  ;;  %v462_v10 = vld [vmem:[%s4289_s1 + $0x30] sm:$0xff]  ;;  %v2419_v11 = vld [vmem:[%s4289_s1 + $0x60] sm:$0xff]  ;;  %s2655_s22 = sshll.u32 %s434_s23, 5  ;;  %vm450_vm4 = vcmask 224259   ;;  %vm963_vm5 = vcmask 949248  }
  0x1b   : > { %578 = vmatpush.msra.mxu2 %v2427_v5  ;;  %2656 = vmatpush.msk.msra.mxu3 %vm497_vm0, %v465_v6  ;;  %v2420_v12 = vld [vmem:[%s4289_s1 + $0x68] sm:$0xff]  ;;  %v2421_v13 = vld [vmem:[%s4289_s1 + $0x70] sm:$0xff]  ;;  %v459_v14 = vld [vmem:[%s4289_s1 + $0x18] sm:$0xff]  ;;  %s437_s14 = scalar_lea.vmem %s4311_s0, %s2655_s22  ;;  %vm1002_vm6 = vcmask 1041408   ;;  %vm1039_vm7 = vcmask 1040384   ;;  %vm1051_vm8 = vcmask 97281  }
  0x1c   : > { %521 = vmatpush.msra.mxu0 %v2422_v7  ;;  %550 = vmatpush.msra.mxu1 %v2423_v8  ;;  %v456_v15 = vld [vmem:[%s4289_s1] sm:$0xff]  ;;  %v439_v17 = vld [vmem:[%s437_s14 + $0x8] sm:$0xff]  ;;  %v440_v18 = vld [vmem:[%s437_s14 + $0x10] sm:$0xff]  ;;  %vm1054_vm9 = vcmask 96256   ;;  %vm1193_vm11 = vcmask 1046528   ;;  %vm1202_vm12 = vcmask 97280  }
  0x1d   : > { %579 = vmatpush.msra.mxu2 %v2424_v9  ;;  %2657 = vmatpush.msra.mxu3 %v462_v10  ;;  %v438_v16 = vld [vmem:[%s437_s14] sm:$0xff]  ;;  %v441_v19 = vld [vmem:[%s437_s14 + $0x18] sm:$0xf]  ;;  %v2471_v20 = vld [vmem:[%s4289_s1 + $0x110] sm:$0xf]  ;;  %444 = vst.msk [vmem:[#allocation2 + $0x9] sm:$0xff] %vm442_vm1, %v439_v17 }
  0x1e   : > { %522 = vmatpush.msra.mxu0 %v2419_v11  ;;  %551 = vmatpush.msra.mxu1 %v2420_v12  ;;  %443 = vst.msk [vmem:[#allocation2 + $0x1] sm:$0xff] %vm442_vm1, %v438_v16  ;;  %v466_v21 = vld [vmem:[%s4289_s1 + $0x50] sm:$0xf]  ;;  %v2470_v22 = vld [vmem:[%s4289_s1 + $0x108] sm:$0xf]  ;;  %v2468_v23 = vld [vmem:[%s4289_s1 + $0xf8] sm:$0xff] }
  0x1f   : > { %580 = vmatpush.msra.mxu2 %v2421_v13  ;;  %2658 = vmatpush.msra.mxu3 %v459_v14  ;;  %445 = vst.msk [vmem:[#allocation2 + $0x11] sm:$0xff] %vm442_vm1, %v440_v18  ;;  %v463_v24 = vld [vmem:[%s4289_s1 + $0x38] sm:$0xff]  ;;  %v2467_v25 = vld [vmem:[%s4289_s1 + $0xf0] sm:$0xff]  ;;  %v460_v26 = vld [vmem:[%s4289_s1 + $0x20] sm:$0xff]  ;;  %vm1570_vm13 = vcmask 1045504   ;;  %vm1738_vm14 = vcmask 113664  }
  0x20   : > { %2446 = vmatpush.msk.msrb.mxu1 %vm497_vm0, %v465_v6  ;;  %2451 = vmatpush.msk.msrb.mxu0 %vm497_vm0, %v466_v21  ;;  %447 = vst.msk [vmem:[#allocation2 + $0x19] sm:$0xf] %vm446_vm2, %v441_v19  ;;  %v2465_v27 = vld [vmem:[%s4289_s1 + $0xe0] sm:$0xff]  ;;  %v2464_v28 = vld [vmem:[%s4289_s1 + $0xd8] sm:$0xff]  ;;  %v2462_v30 = vld [vmem:[%s4289_s1 + $0xc8] sm:$0xff]  ;;  %s2778_s23 = smov 72  }
  0x21   : > { %2659 = vmatpush.msra.mxu3 %v456_v15  ;;  %2473 = vmatpush.msk.msrb.mxu2 %vm497_vm0, %v2470_v22  ;;  %449 = vst.msk [vmem:[#allocation2] sm:$0x1] %vm448_vm3, %v438_v16  ;;  %v457_v32 = vld [vmem:[%s4289_s1 + $0x8] sm:$0xff]  ;;  %v2461_v33 = vld [vmem:[%s4289_s1 + $0xc0] sm:$0xff]  ;;  %v467_v38 = vld [vmem:[%s4289_s1 + $0x58] sm:$0xf] }
  0x22   : > { %628 = vmatpush.msrb.mxu1 %v462_v10  ;;  %657 = vmatpush.msrb.mxu0 %v463_v24  ;;  %451 = vst.msk [vmem:[#allocation2 + $0x1a] sm:$0x8] %vm450_vm4, %v441_v19  ;;  %v464_v41 = vld [vmem:[%s4289_s1 + $0x40] sm:$0xff]  ;;  %v2472_v42 = vld [vmem:[%s4289_s1 + $0x118] sm:$0xf]  ;;  %v461_v43 = vld [vmem:[%s4289_s1 + $0x28] sm:$0xff] }
  0x23   : > { %2478 = vmatpush.msk.msrb.mxu3 %vm497_vm0, %v2471_v20  ;;  %753 = vmatpush.msrb.mxu2 %v2467_v25  ;;  %v2469_v44 = vld [vmem:[%s4289_s1 + $0x100] sm:$0xff]  ;;  %v458_v45 = vld [vmem:[%s4289_s1 + $0x10] sm:$0xff]  ;;  %v2466_v46 = vld [vmem:[%s4289_s1 + $0xe8] sm:$0xff]  ;;  %s431_s14 = sand.u32 1, %s2762_s26  }
  0x24   : > { %629 = vmatpush.msrb.mxu1 %v459_v14  ;;  %658 = vmatpush.msrb.mxu0 %v460_v26  ;;  %v469_v34 = vld [vmem:[#allocation2 + $0x9] sm:$0xff]  ;;  %s2346_s17 = scalar_lea.sflag [#allocation6], %s431_s14 }
  0x25   : > { %782 = vmatpush.msrb.mxu3 %v2468_v23  ;;  %v468_v29 = vld [vmem:[#allocation2 + $0x1] sm:$0xff]  ;;  %754 = vmatpush.msrb.mxu2 %v2464_v28 }
  0x26   : > { %2432 = vmatmul.msk.f32.vlgmr.msra.gmra.mxu0 %vm442_vm1, %v468_v29  ;;  %2437 = vmatmul.msk.f32.vlgmr.msra.gmra.mxu1 %vm442_vm1, %v468_v29  ;;  %v453_v31 = vld [vmem:[#allocation2 + $0x8] sm:$0xff]  ;;  %v454_v35 = vld [vmem:[#allocation2 + $0x10] sm:$0xff] }
  0x27   : > { %783 = vmatpush.msrb.mxu3 %v2465_v27  ;;  %2442 = vmatmul.msk.f32.vlgmr.msra.gmra.mxu2 %vm442_vm1, %v468_v29  ;;  %v470_v36 = vld [vmem:[#allocation2 + $0x11] sm:$0xff]  ;;  %v471_v39 = vld [vmem:[#allocation2 + $0x19] sm:$0xf]  ;;  %v702_v40 = vld [vmem:[#allocation2 + $0x2] sm:$0xff] }
  0x28   : > { %2448 = vmatmul.msk.f32.vlgmr.msra.gmra.mxu3 %vm442_vm1, %v453_v31  ;;  %630 = vmatpush.msrb.mxu1 %v456_v15  ;;  %v455_v37 = vld [vmem:[#allocation2 + $0x18] sm:$0xf]  ;;  %v452_v47 = vld [vmem:[#allocation2] sm:$0xff]  ;;  %v703_v48 = vld [vmem:[#allocation2 + $0xa] sm:$0xff] }
  0x29   : > { %784 = vmatpush.msrb.mxu3 %v2462_v30  ;;  %659 = vmatpush.msrb.mxu0 %v457_v32  ;;  %v2463_v49 = vld [vmem:[%s4289_s1 + $0xd0] sm:$0xff]  ;;  %v704_v50 = vld [vmem:[#allocation2 + $0x12] sm:$0xff]  ;;  %v705_v51 = vld [vmem:[#allocation2 + $0x1a] sm:$0xf] }
  0x2a   : > { %755 = vmatpush.msrb.mxu2 %v2461_v33  ;;  %2456 = vmatpush.msk.msra.mxu1 %vm497_vm0, %v467_v38  ;;  %v839_v30 = vld [vmem:[%s4290_s2] sm:$0xff]  ;;  %v840_v38 = vld [vmem:[%s4290_s2 + $0x8] sm:$0xff] }
  0x2b   : > { %2483 = vmatpush.msk.msra.mxu0 %vm497_vm0, %v2472_v42 }
  0x2c   : > { %686 = vmatpush.msra.mxu1 %v464_v41 }
  0x2d   : > { %811 = vmatpush.msra.mxu0 %v2469_v44 }
  0x2e   : > { %2433 = vmatmul.msk.f32.gmra.mxu0 %vm442_vm1, %v469_v34  ;;  %2438 = vmatmul.msk.f32.gmra.mxu1 %vm442_vm1, %v469_v34 }
  0x2f   : > { %2443 = vmatmul.msk.f32.gmra.mxu2 %vm442_vm1, %v469_v34  ;;  %687 = vmatpush.msra.mxu1 %v461_v43 }
  0x30   : > { %2449 = vmatmul.msk.f32.gmra.mxu3 %vm442_vm1, %v454_v35  ;;  %812 = vmatpush.msra.mxu0 %v2466_v46 }
  0x31   : > { %688 = vmatpush.msra.mxu1 %v458_v45 }
  0x32   : > { %813 = vmatpush.msra.mxu0 %v2463_v49 }
  0x36   : > { %2434 = vmatmul.msk.f32.gmra.mxu0 %vm442_vm1, %v470_v36  ;;  %2439 = vmatmul.msk.f32.gmra.mxu1 %vm442_vm1, %v470_v36 }
  0x37   : > { %2444 = vmatmul.msk.f32.gmra.mxu2 %vm442_vm1, %v470_v36 }
  0x38   : > { %2450 = vmatmul.msk.f32.gmra.mxu3 %vm442_vm1, %v455_v37 }
  0x3e   : > { %2435 = vmatmul.msk.f32.gmra.mxu0 %vm442_vm1, %v471_v39  ;;  %2440 = vmatmul.msk.f32.gmra.mxu1 %vm442_vm1, %v471_v39 }
  0x3f   : > { %2445 = vmatmul.msk.f32.gmra.mxu2 %vm442_vm1, %v471_v39 }
  0x40   : > { %2479 = vmatmul.msk.f32.vlgmr.msrb.gmra.mxu3 %vm442_vm1, %v702_v40 }
  0x46   : > { %2447 = vmatmul.msk.f32.vlgmr.msrb.gmra.mxu1 %vm442_vm1, %v452_v47  ;;  %2452 = vmatmul.msk.f32.vlgmr.msrb.gmra.mxu0 %vm442_vm1, %v452_v47 }
  0x47   : > { %2474 = vmatmul.msk.f32.vlgmr.msrb.gmra.mxu2 %vm442_vm1, %v702_v40 }
  0x48   : > { %2480 = vmatmul.msk.f32.gmra.mxu3 %vm442_vm1, %v703_v48 }
  0x4e   : > { %2453 = vmatmul.msk.f32.gmra.mxu0 %vm442_vm1, %v453_v31  ;;  %2457 = vmatmul.msk.f32.vlgmr.msra.gmra.mxu1 %vm442_vm1, %v452_v47  ;;  %v842_v47 = vld [vmem:[%s4290_s2 + $0x18] sm:$0xf] }
  0x4f   : > { %2475 = vmatmul.msk.f32.gmra.mxu2 %vm442_vm1, %v703_v48 }
  0x50   : > { %2481 = vmatmul.msk.f32.gmra.mxu3 %vm442_vm1, %v704_v50 }
  0x56   : > { %2454 = vmatmul.msk.f32.gmra.mxu0 %vm442_vm1, %v454_v35  ;;  %2458 = vmatmul.msk.f32.gmra.mxu1 %vm442_vm1, %v453_v31 }
  0x57   : > { %2476 = vmatmul.msk.f32.gmra.mxu2 %vm442_vm1, %v704_v50 }
  0x58   : > { %2482 = vmatmul.msk.f32.gmra.mxu3 %vm442_vm1, %v705_v51 }
  0x5e   : > { %2455 = vmatmul.msk.f32.gmra.mxu0 %vm442_vm1, %v455_v37  ;;  %2459 = vmatmul.msk.f32.gmra.mxu1 %vm442_vm1, %v454_v35 }
  0x5f   : > { %2477 = vmatmul.msk.f32.gmra.mxu2 %vm442_vm1, %v705_v51 }
  0x66   : > { %2484 = vmatmul.msk.f32.vlgmr.msra.gmra.mxu0 %vm442_vm1, %v702_v40  ;;  %2460 = vmatmul.msk.f32.gmra.mxu1 %vm442_vm1, %v455_v37  ;;  %v841_v40 = vld [vmem:[%s4290_s2 + $0x10] sm:$0xff] }
  0x6e   : > { %2485 = vmatmul.msk.f32.gmra.mxu0 %vm442_vm1, %v703_v48 }
  0x76   : > { %2486 = vmatmul.msk.f32.gmra.mxu0 %vm442_vm1, %v704_v50 }
  0x7e   : > { %2487 = vmatmul.msk.f32.gmra.mxu0 %vm442_vm1, %v705_v51 }
  0xa3   : > { %v524_v52 = vpop.f32.mrf.mxu0  ;;  %v553_v53 = vpop.f32.mrf.mxu1 }
  0xaa   : > { %v3059_v54 = vpop.f32.mrf.mxu2 }
  0xab   : > { %v635_v55 = vpop.f32.mrf.mxu3  ;;  %v527_v56 = vpop.f32.mrf.mxu0 }
  0xac   : > { %v556_v57 = vpop.f32.mrf.mxu1  ;;  %v636_v31 = vadd.f32 %v635_v55, %v527_v56 }
  0xb2   : > { %v3061_v58 = vpop.f32.mrf.mxu2 }
  0xb3   : > { %v638_v59 = vpop.f32.mrf.mxu3  ;;  %v530_v60 = vpop.f32.mrf.mxu0 }
  0xb4   : > { %v559_v63 = vpop.f32.mrf.mxu1  ;;  %v639_v26 = vadd.f32 %v638_v59, %v530_v60  ;;  %v2542_v59 = vld [vmem:[%s4292_s4 + $0x2e8] sm:$0xff] }
  0xba   : > { %v588_v61 = vpop.f32.mrf.mxu2 }
  0xbb   : > { %v641_v62 = vpop.f32.mrf.mxu3  ;;  %v533_v0 = vpop.f32.mrf.mxu0 }
  0xbc   : > { %v562_v4 = vpop.f32.mrf.mxu1  ;;  %v642_v22 = vadd.f32 %v641_v62, %v533_v0  ;;  %v2536_v0 = vld [vmem:[%s4292_s4 + $0x2b8] sm:$0xff] }
  0xc2   : > { %v591_v1 = vpop.f32.mrf.mxu2 }
  0xc3   : > { %v786_v2 = vpop.f32.mrf.mxu3  ;;  %v661_v3 = vpop.f32.mrf.mxu0 }
  0xc4   : > { %v632_v8 = vpop.f32.mrf.mxu1  ;;  %v662_v20 = vadd.f32 %v661_v3, %v553_v53  ;;  %v2530_v3 = vld [vmem:[%s4292_s4 + $0x288] sm:$0xff] }
  0xc5   : > { %v633_v33 = vadd.f32 %v632_v8, %v524_v52  ;;  %v2521_v8 = vld [vmem:[%s4292_s4 + $0x240] sm:$0xff] }
  0xc6   : > { %v828_v29 = vadd.f32 %v786_v2, %v662_v20  ;;  %v2549_v2 = vld [vmem:[%s4292_s4 + $0x320] sm:$0xff] }
  0xc7   : > { %v2525_v20 = vld [vmem:[%s4292_s4 + $0x260] sm:$0xff] }
  0xca   : > { %v757_v5 = vpop.f32.mrf.mxu2 }
  0xcb   : > { %v789_v6 = vpop.f32.mrf.mxu3  ;;  %v664_v7 = vpop.f32.mrf.mxu0  ;;  %v827_v35 = vadd.f32 %v757_v5, %v633_v33  ;;  %v2546_v5 = vld [vmem:[%s4292_s4 + $0x308] sm:$0xff] }
  0xcc   : > { %v690_v12 = vpop.f32.mrf.mxu1  ;;  %v665_v18 = vadd.f32 %v664_v7, %v556_v57  ;;  %v2548_v57 = vld [vmem:[%s4292_s4 + $0x318] sm:$0xff]  ;;  %v2543_v7 = vld [vmem:[%s4292_s4 + $0x2f0] sm:$0xff]  ;;  %v2510_v33 = vld [vmem:[%s4292_s4 + $0x1e8] sm:$0xff] }
  0xcd   : > { %v691_v48 = vadd.f32 %v690_v12, %v3059_v54  ;;  %1216 = vmatpush.msrb.mxu0 %v2548_v57  ;;  %v2552_v57 = vld [vmem:[%s4292_s4 + $0x338] sm:$0xff] }
  0xce   : > { %v831_v24 = vadd.f32 %v789_v6, %v665_v18  ;;  %v2524_v6 = vld [vmem:[%s4292_s4 + $0x258] sm:$0xff] }
  0xcf   : > { %v2528_v18 = vld [vmem:[%s4292_s4 + $0x278] sm:$0xff] }
  0xd2   : > { %v760_v9 = vpop.f32.mrf.mxu2 }
  0xd3   : > { %v792_v10 = vpop.f32.mrf.mxu3  ;;  %v667_v11 = vpop.f32.mrf.mxu0  ;;  %v830_v34 = vadd.f32 %v760_v9, %v636_v31  ;;  %v2540_v9 = vld [vmem:[%s4292_s4 + $0x2d8] sm:$0xff]  ;;  %v2541_v31 = vld [vmem:[%s4292_s4 + $0x2e0] sm:$0xff] }
  0xd4   : > { %v668_v16 = vadd.f32 %v667_v11, %v559_v63  ;;  %v693_v23 = vpop.f32.mrf.mxu1  ;;  %v2539_v63 = vld [vmem:[%s4292_s4 + $0x2d0] sm:$0xff]  ;;  %v2537_v11 = vld [vmem:[%s4292_s4 + $0x2c0] sm:$0xff] }
  0xd5   : > { %v694_v45 = vadd.f32 %v693_v23, %v3061_v58  ;;  %v2545_v58 = vld [vmem:[%s4292_s4 + $0x300] sm:$0xff]  ;;  %v2550_v23 = vld [vmem:[%s4292_s4 + $0x328] sm:$0xff] }
  0xd6   : > { %v834_v21 = vadd.f32 %v792_v10, %v668_v16  ;;  %1217 = vmatpush.msrb.mxu0 %v2545_v58  ;;  %v2518_v10 = vld [vmem:[%s4292_s4 + $0x228] sm:$0xff]  ;;  %v2531_v16 = vld [vmem:[%s4292_s4 + $0x290] sm:$0xff]  ;;  %v2520_v58 = vld [vmem:[%s4292_s4 + $0x238] sm:$0xff] }
  0xd8   : > { %1218 = vmatpush.msrb.mxu0 %v2542_v59  ;;  %v2553_v59 = vld [vmem:[%s4292_s4 + $0x340] sm:$0xff] }
  0xda   : > { %v763_v13 = vpop.f32.mrf.mxu2  ;;  %1219 = vmatpush.msrb.mxu0 %v2539_v63  ;;  %v1109_v63 = vld [vmem:[%s4292_s4 + $0x108] sm:$0xff] }
  0xdb   : > { %v670_v14 = vpop.f32.mrf.mxu0  ;;  %v795_v15 = vpop.f32.mrf.mxu3  ;;  %v833_v32 = vadd.f32 %v763_v13, %v639_v26  ;;  %v2515_v13 = vld [vmem:[%s4292_s4 + $0x210] sm:$0xff] }
  0xdc   : > { %v671_v17 = vadd.f32 %v670_v14, %v562_v4  ;;  %v696_v37 = vpop.f32.mrf.mxu1  ;;  %1220 = vmatpush.msrb.mxu0 %v2536_v0  ;;  %v2527_v4 = vld [vmem:[%s4292_s4 + $0x270] sm:$0xff]  ;;  %v2534_v14 = vld [vmem:[%s4292_s4 + $0x2a8] sm:$0xff] }
  0xdd   : > { %v697_v43 = vadd.f32 %v696_v37, %v588_v61  ;;  %v2547_v26 = vld [vmem:[%s4292_s4 + $0x310] sm:$0xff] }
  0xde   : > { %v837_v19 = vadd.f32 %v795_v15, %v671_v17  ;;  %v2512_v15 = vld [vmem:[%s4292_s4 + $0x1f8] sm:$0xff]  ;;  %v2509_v17 = vld [vmem:[%s4292_s4 + $0x1e0] sm:$0xff] }
  0xe0   : > { %2493 = vmatpush.msk.msra.mxu2 %vm497_vm0, %v837_v19  ;;  %v2506_v19 = vld [vmem:[%s4292_s4 + $0x1c8] sm:$0xff] }
  0xe2   : > { %v766_v25 = vpop.f32.mrf.mxu2  ;;  %906 = vmatpush.msra.mxu2 %v834_v21  ;;  %v2503_v21 = vld [vmem:[%s4292_s4 + $0x1b0] sm:$0xff] }
  0xe3   : > { %v836_v27 = vadd.f32 %v766_v25, %v642_v22  ;;  %v815_v28 = vpop.f32.mrf.mxu0  ;;  %v2522_v22 = vld [vmem:[%s4292_s4 + $0x248] sm:$0xff]  ;;  %v2519_v25 = vld [vmem:[%s4292_s4 + $0x230] sm:$0xff] }
  0xe4   : > { %907 = vmatpush.msra.mxu2 %v831_v24  ;;  %v699_v41 = vpop.f32.mrf.mxu1  ;;  %v829_v51 = vadd.f32 %v815_v28, %v691_v48  ;;  %v2544_v28 = vld [vmem:[%s4292_s4 + $0x2f8] sm:$0xff] }
  0xe5   : > { %2488 = vmatpush.msk.msrb.mxu1 %vm497_vm0, %v836_v27  ;;  %v700_v42 = vadd.f32 %v699_v41, %v591_v1  ;;  %v2533_v1 = vld [vmem:[%s4292_s4 + $0x2a0] sm:$0xff]  ;;  %v2516_v27 = vld [vmem:[%s4292_s4 + $0x218] sm:$0xff] }
  0xe6   : > { %908 = vmatpush.msra.mxu2 %v828_v29  ;;  %1221 = vmatpush.msrb.mxu0 %v2533_v1 }
  0xe7   : > { %877 = vmatpush.msrb.mxu1 %v833_v32  ;;  %2494 = vmatmul.msk.f32.vlgmr.msra.gmra.mxu2 %vm442_vm1, %v839_v30 }
  0xe8   : > { %1262 = vmatpush.msrb.mxu2 %v2549_v2  ;;  %1222 = vmatpush.msrb.mxu0 %v2530_v3  ;;  %v2517_v3 = vld [vmem:[%s4292_s4 + $0x220] sm:$0xff] }
  0xe9   : > { %878 = vmatpush.msrb.mxu1 %v830_v34  ;;  %v2538_v34 = vld [vmem:[%s4292_s4 + $0x2c8] sm:$0xff] }
  0xea   : > { %1223 = vmatpush.msrb.mxu0 %v2527_v4  ;;  %1263 = vmatpush.msrb.mxu2 %v2546_v5 }
  0xeb   : > { %879 = vmatpush.msrb.mxu1 %v827_v35  ;;  %v818_v36 = vpop.f32.mrf.mxu0  ;;  %v2507_v35 = vld [vmem:[%s4292_s4 + $0x1d0] sm:$0xff] }
  0xec   : > { %2489 = vmatmul.msk.f32.vlgmr.msrb.gmra.mxu1 %vm442_vm1, %v839_v30  ;;  %v832_v50 = vadd.f32 %v818_v36, %v694_v45  ;;  %1224 = vmatpush.msrb.mxu0 %v2524_v6  ;;  %v2535_v36 = vld [vmem:[%s4292_s4 + $0x2b0] sm:$0xff]  ;;  %v2526_v45 = vld [vmem:[%s4292_s4 + $0x268] sm:$0xff]  ;;  %v3296_v6 = vld [vmem:[%s4291_s3] sm:$0x3] }
  0xed   : > { %1264 = vmatpush.msrb.mxu2 %v2543_v7 }
  0xee   : > { %1225 = vmatpush.msrb.mxu0 %v2521_v8 }
  0xef   : > { %2495 = vmatmul.msk.f32.gmra.mxu2 %vm442_vm1, %v840_v38 }
  0xf0   : > { %1265 = vmatpush.msrb.mxu2 %v2540_v9  ;;  %1226 = vmatpush.msrb.mxu0 %v2518_v10  ;;  %v2514_v9 = vld [vmem:[%s4292_s4 + $0x208] sm:$0xff] }
  0xf2   : > { %1266 = vmatpush.msrb.mxu2 %v2537_v11  ;;  %1227 = vmatpush.msrb.mxu0 %v2515_v13 }
  0xf3   : > { %v821_v39 = vpop.f32.mrf.mxu0 }
  0xf4   : > { %2490 = vmatmul.msk.f32.gmra.mxu1 %vm442_vm1, %v840_v38  ;;  %v835_v49 = vadd.f32 %v821_v39, %v697_v43  ;;  %1267 = vmatpush.msrb.mxu2 %v2534_v14  ;;  %v2532_v39 = vld [vmem:[%s4292_s4 + $0x298] sm:$0xff]  ;;  %v2554_v43 = vld [vmem:[%s4292_s4 + $0x348] sm:$0xf] }
  0xf5   : > { %1228 = vmatpush.msrb.mxu0 %v2512_v15  ;;  %2557 = vmatpush.msk.msra.mxu1 %vm497_vm0, %v2554_v43  ;;  %v1085_v43 = vld [vmem:[%s4292_s4 + $0x48] sm:$0xff] }
  0xf6   : > { %1268 = vmatpush.msrb.mxu2 %v2531_v16  ;;  %v1024_v16 = vperm.slane %v3296_v6, 1 }
  0xf7   : > { %2496 = vmatmul.msk.f32.gmra.mxu2 %vm442_vm1, %v841_v40  ;;  %1229 = vmatpush.msrb.mxu0 %v2509_v17  ;;  %v2511_v17 = vld [vmem:[%s4292_s4 + $0x1f0] sm:$0xff] }
  0xf8   : > { %1269 = vmatpush.msrb.mxu2 %v2528_v18  ;;  %v1100_v18 = vld [vmem:[%s4292_s4 + $0xc0] sm:$0xff] }
  0xf9   : > { %1230 = vmatpush.msrb.mxu0 %v2506_v19 }
  0xfa   : > { %1270 = vmatpush.msrb.mxu2 %v2525_v20 }
  0xfb   : > { %v824_v44 = vpop.f32.mrf.mxu0  ;;  %1231 = vmatpush.msrb.mxu0 %v2503_v21  ;;  %v1023_v21 = vperm.slane %v3296_v6, 0  ;;  %v1122_v6 = vld [vmem:[%s4292_s4 + $0x170] sm:$0xff] }
  0xfc   : > { %v838_v46 = vadd.f32 %v824_v44, %v700_v42  ;;  %2491 = vmatmul.msk.f32.gmra.mxu1 %vm442_vm1, %v841_v40  ;;  %1271 = vmatpush.msrb.mxu2 %v2522_v22  ;;  %v2529_v42 = vld [vmem:[%s4292_s4 + $0x280] sm:$0xff]  ;;  %v1118_v44 = vld [vmem:[%s4292_s4 + $0x150] sm:$0xff] }
  0xfd   : > { %1308 = vmatpush.msra.mxu0 %v2550_v23  ;;  %v2508_v23 = vld [vmem:[%s4292_s4 + $0x1d8] sm:$0xff] }
  0xfe   : > { %2498 = vmatpush.msk.msra.mxu3 %vm497_vm0, %v838_v46  ;;  %1272 = vmatpush.msrb.mxu2 %v2519_v25  ;;  %v2551_v46 = vld [vmem:[%s4292_s4 + $0x330] sm:$0xff] }
  0xff   : > { %2497 = vmatmul.msk.f32.gmra.mxu2 %vm442_vm1, %v842_v47  ;;  %1309 = vmatpush.msra.mxu0 %v2547_v26  ;;  %v1097_v26 = vld [vmem:[%s4292_s4 + $0xa8] sm:$0xff] }
 0x100   : > { %935 = vmatpush.msra.mxu3 %v835_v49  ;;  %1273 = vmatpush.msrb.mxu2 %v2516_v27  ;;  %v2555_v49 = vld [vmem:[%s4292_s4 + $0x350] sm:$0xf] }
 0x101   : > { %1310 = vmatpush.msra.mxu0 %v2544_v28  ;;  %1254 = vmatpush.msra.mxu1 %v2551_v46 }
 0x102   : > { %936 = vmatpush.msra.mxu3 %v832_v50  ;;  %v2523_v50 = vld [vmem:[%s4292_s4 + $0x250] sm:$0xff] }
 0x103   : > { %1311 = vmatpush.msra.mxu0 %v2541_v31 }
 0x104   : > { %937 = vmatpush.msra.mxu3 %v829_v51  ;;  %2492 = vmatmul.msk.f32.gmra.mxu1 %vm442_vm1, %v842_v47  ;;  %v2556_v51 = vld [vmem:[%s4292_s4 + $0x358] sm:$0xf] }
 0x105   : > { %2499 = vmatmul.msk.f32.vlgmr.msra.gmra.mxu3 %vm442_vm1, %v839_v30  ;;  %v2513_v30 = vld [vmem:[%s4292_s4 + $0x200] sm:$0xff]  ;;  %1312 = vmatpush.msra.mxu0 %v2538_v34 }
 0x106   : > { %1274 = vmatpush.msrb.mxu2 %v2513_v30  ;;  %2560 = vmatpush.msk.msrb.mxu3 %vm497_vm0, %v2555_v49 }
 0x107   : > { %1313 = vmatpush.msra.mxu0 %v2535_v36  ;;  %2563 = vmatpush.msk.msrb.mxu1 %vm497_vm0, %v2556_v51  ;;  %v1091_v36 = vld [vmem:[%s4292_s4 + $0x78] sm:$0xff]  ;;  %v1082_v51 = vld [vmem:[%s4292_s4 + $0x30] sm:$0xff] }
 0x108   : > { %1275 = vmatpush.msrb.mxu2 %v2510_v33  ;;  %1300 = vmatpush.msrb.mxu3 %v2552_v57 }
 0x109   : > { %1314 = vmatpush.msra.mxu0 %v2532_v39  ;;  %1346 = vmatpush.msrb.mxu1 %v2553_v59  ;;  %v1088_v39 = vld [vmem:[%s4292_s4 + $0x60] sm:$0xff]  ;;  %v1079_v59 = vld [vmem:[%s4292_s4 + $0x18] sm:$0xff] }
 0x10a   : > { %1276 = vmatpush.msrb.mxu2 %v2507_v35  ;;  %v1127_v35 = vld [vmem:[%s4292_s4 + $0x198] sm:$0xf] }
 0x10b   : > { %1315 = vmatpush.msra.mxu0 %v2529_v42  ;;  %2566 = vmatpush.msk.msra.mxu3 %vm497_vm0, %v1127_v35  ;;  %v2614_v35 = vld [vmem:[%s4292_s4 + $0x498] sm:$0xff] }
 0x10d   : > { %2500 = vmatmul.msk.f32.gmra.mxu3 %vm442_vm1, %v840_v38  ;;  %v2504_v38 = vld [vmem:[%s4292_s4 + $0x1b8] sm:$0xff]  ;;  %1316 = vmatpush.msra.mxu0 %v2526_v45 }
 0x10e   : > { %1277 = vmatpush.msrb.mxu2 %v2504_v38 }
 0x10f   : > { %1317 = vmatpush.msra.mxu0 %v2523_v50 }
 0x111   : > { %1318 = vmatpush.msra.mxu0 %v2520_v58 }
 0x113   : > { %1319 = vmatpush.msra.mxu0 %v2517_v3 }
 0x115   : > { %2501 = vmatmul.msk.f32.gmra.mxu3 %vm442_vm1, %v841_v40  ;;  %v1121_v40 = vld [vmem:[%s4292_s4 + $0x168] sm:$0xff]  ;;  %1320 = vmatpush.msra.mxu0 %v2514_v9  ;;  %v1119_v9 = vld [vmem:[%s4292_s4 + $0x158] sm:$0xff] }
 0x116   : > { %1369 = vmatpush.msra.mxu2 %v1121_v40 }
 0x117   : > { %1321 = vmatpush.msra.mxu0 %v2511_v17 }
 0x118   : > { %1370 = vmatpush.msra.mxu2 %v1118_v44 }
 0x119   : > { %1322 = vmatpush.msra.mxu0 %v2508_v23  ;;  %v1126_v23 = vld [vmem:[%s4292_s4 + $0x190] sm:$0xff] }
 0x11d   : > { %2502 = vmatmul.msk.f32.gmra.mxu3 %vm442_vm1, %v842_v47  ;;  %v1115_v47 = vld [vmem:[%s4292_s4 + $0x138] sm:$0xff] }
 0x11e   : > { %1371 = vmatpush.msra.mxu2 %v1115_v47 }
 0x169   : > { %v3160_v12 = vpop.f32.mrf.mxu1 }
 0x16a   : > { %v3092_v52 = vpop.f32.mrf.mxu2 }
 0x171   : > { %v3195_v24 = vpop.f32.mrf.mxu1 }
 0x172   : > { %v3094_v53 = vpop.f32.mrf.mxu2 }
 0x173   : > { %959 = vrot.lane.b32.xlu2 %v3094_v53, %s2772_s21 }
 0x179   : > { %v887_v37 = vpop.f32.mrf.mxu1 }
 0x17a   : > { %v3098_v54 = vpop.f32.mrf.mxu2 }
 0x17b   : > { %978 = vrot.lane.b32.xlu2 %v3098_v54, %s2772_s21 }
 0x182   : > { %v3113_v61 = vpop.f32.mrf.mxu2 }
 0x188   : > { %v939_v55 = vpop.f32.mrf.mxu3 }
 0x190   : > { %v942_v56 = vpop.f32.mrf.mxu3 }
 0x191   : > { %961 = vrot.lane.b32.xlu0 %v942_v56, %s2772_s21  ;;  %v1112_v56 = vld [vmem:[%s4292_s4 + $0x120] sm:$0xff] }
 0x192   : > { %1372 = vmatpush.msra.mxu2 %v1112_v56 }
 0x194   : > { %1373 = vmatpush.msra.mxu2 %v1109_v63 }
 0x198   : > { %v945_v60 = vpop.f32.mrf.mxu3 }
 0x199   : > { %980 = vrot.lane.b32.xlu0 %v945_v60, %s2772_s21 }
 0x1a0   : > { %v948_v62 = vpop.f32.mrf.mxu3 }
 0x1a1   : > { %982 = vrot.lane.b32.xlu0 %v3113_v61, %s2772_s21  ;;  %984 = vrot.lane.b32.xlu1 %v948_v62, %s2772_s21  ;;  %v890_v62 = vpop.f32.mrf.mxu1 }
 0x1a9   : > { %957 = vrot.lane.b32.xlu1 %v939_v55, %s2772_s21 }
 0x1b1   : > { %955 = vrot.lane.b32.xlu1 %v3092_v52, %s2772_s21 }
 0x1cd   : > { %v960_v32 = vpop.permute.xlu2 %959 }
 0x1d5   : > { %v979_v48 = vpop.permute.xlu2 %978 }
 0x203   : > { %v3209_v29 = vpop.permute.xlu0 %961 }
 0x204   : > { %v965_v7 = vsel %vm963_vm5, %v960_v32, %v3209_v29  ;;  %v973_v13 = vmax.f32 %v3094_v53, %v3209_v29  ;;  %v2505_v29 = vld [vmem:[%s4292_s4 + $0x1c0] sm:$0xff]  ;;  %v1094_v32 = vld [vmem:[%s4292_s4 + $0x90] sm:$0xff] }
 0x205   : > { %v972_v19 = vmax.f32 %v3195_v24, %v965_v7  ;;  %1323 = vmatpush.msra.mxu0 %v2505_v29  ;;  %v1128_v7 = vld [vmem:[%s4292_s4 + $0x1a0] sm:$0xf]  ;;  %v2620_v29 = vld [vmem:[%s4292_s4 + $0x4c8] sm:$0xff] }
 0x206   : > { %v1006_v24 = vrot.slane %v973_v13, 6 }
 0x207   : > { %v1003_v45 = vrot.slane %v972_v19, 6 }
 0x20b   : > { %v981_v41 = vpop.permute.xlu0 %980 }
 0x20c   : > { %v986_v55 = vsel %vm963_vm5, %v979_v48, %v981_v41  ;;  %v993_v60 = vmax.f32 %v3098_v54, %v981_v41  ;;  %v1106_v54 = vld [vmem:[%s4292_s4 + $0xf0] sm:$0xff]  ;;  %v1058_v41 = vlaneseq }
 0x20d   : > { %v992_v0 = vmax.f32 %v887_v37, %v986_v55  ;;  %1374 = vmatpush.msra.mxu2 %v1106_v54 }
 0x20e   : > { %v1007_v10 = vrot.slane %v993_v60, 6  ;;  %vm3351_vm10 = vcmp.lt.s32.totalorder %v1058_v41, 140  ;;  %v1076_v60 = vld [vmem:[%s4292_s4] sm:$0xff]  ;;  %vm3932_vm15 = vcmp.ge.s32.totalorder %v1058_v41, 12  ;;  %vm3937_vm1 = vcmp.lt.s32.totalorder %v1058_v41, 152 }
 0x20f   : > { %v1004_v14 = vrot.slane %v992_v0, 6  ;;  %vm1886_vm2 = vmand %vm3932_vm15, %vm3937_vm1  ;;  %vm4004_vm3 = vcmp.ge.s32.totalorder %v1058_v41, 24  ;;  %vm4009_vm4 = vcmp.lt.s32.totalorder %v1058_v41, 164  ;;  %vm1940_vm1 = vcmp.ge.s32.totalorder %v1058_v41, 60 }
 0x210   : > { %v1008_v33 = vsel %vm1002_vm6, %v1006_v24, %v1007_v10  ;;  %v1098_v24 = vld [vmem:[%s4292_s4 + $0xb0] sm:$0xff] }
 0x211   : > { %v1005_v55 = vsel %vm1002_vm6, %v1003_v45, %v1004_v14  ;;  %v1099_v45 = vld [vmem:[%s4292_s4 + $0xb8] sm:$0xff] }
 0x213   : > { %v983_v1 = vpop.permute.xlu0 %982  ;;  %v985_v2 = vpop.permute.xlu1 %984 }
 0x214   : > { %v995_v4 = vmax.f32 %v3113_v61, %v985_v2  ;;  %v987_v5 = vsel %vm963_vm5, %v983_v1, %v985_v2  ;;  %v1103_v61 = vld [vmem:[%s4292_s4 + $0xd8] sm:$0xff] }
 0x215   : > { %v994_v8 = vmax.f32 %v890_v62, %v987_v5  ;;  %1375 = vmatpush.msra.mxu2 %v1103_v61  ;;  %v1125_v61 = vld [vmem:[%s4292_s4 + $0x188] sm:$0xff] }
 0x216   : > { %v1011_v11 = vrot.slane %v995_v4, 6 }
 0x217   : > { %v1009_v15 = vrot.slane %v994_v8, 6  ;;  %1376 = vmatpush.msra.mxu2 %v1100_v18  ;;  %v1123_v18 = vld [vmem:[%s4292_s4 + $0x178] sm:$0xff] }
 0x218   : > { %v1012_v20 = vsel %vm1002_vm6, %v1007_v10, %v1011_v11  ;;  %v1116_v10 = vld [vmem:[%s4292_s4 + $0x140] sm:$0xff]  ;;  %v1113_v11 = vld [vmem:[%s4292_s4 + $0x128] sm:$0xff] }
 0x219   : > { %v1020_v53 = vmax.f32 %v973_v13, %v1012_v20  ;;  %v1010_v22 = vsel %vm1002_vm6, %v1004_v14, %v1009_v15  ;;  %1377 = vmatpush.msra.mxu2 %v1097_v26  ;;  %v1107_v20 = vld [vmem:[%s4292_s4 + $0xf8] sm:$0xff]  ;;  %v1101_v26 = vld [vmem:[%s4292_s4 + $0xc8] sm:$0xff] }
 0x21a   : > { %v1019_v25 = vmax.f32 %v972_v19, %v1010_v22  ;;  %v1104_v22 = vld [vmem:[%s4292_s4 + $0xe0] sm:$0xff] }
 0x21b   : > { %v1030_v27 = vadd.f32 %v1024_v16, %v1020_v53  ;;  %v958_v28 = vpop.permute.xlu1 %957  ;;  %1378 = vmatpush.msra.mxu2 %v1094_v32  ;;  %v1120_v53 = vld [vmem:[%s4292_s4 + $0x160] sm:$0xff]  ;;  %v2617_v32 = vld [vmem:[%s4292_s4 + $0x4b0] sm:$0xff] }
 0x21c   : > { %v1029_v30 = vadd.f32 %v1023_v21, %v1019_v25  ;;  %v971_v31 = vmax.f32 %v3092_v52, %v958_v28  ;;  %v1124_v52 = vld [vmem:[%s4292_s4 + $0x180] sm:$0xff]  ;;  %v1117_v25 = vld [vmem:[%s4292_s4 + $0x148] sm:$0xff] }
 0x21d   : > { %v1034_v34 = vmax.f32 %v1030_v27, 0.0  ;;  %1379 = vmatpush.msra.mxu2 %v1091_v36  ;;  %1407 = vmatpush.msra.mxu3 %v1124_v52  ;;  %v1114_v27 = vld [vmem:[%s4292_s4 + $0x130] sm:$0xff]  ;;  %v1089_v36 = vld [vmem:[%s4292_s4 + $0x68] sm:$0xff] }
 0x21e   : > { %v1033_v37 = vmax.f32 %v1029_v30, 0.0  ;;  %v1018_v38 = vmax.f32 %v971_v31, %v1008_v33  ;;  %v1095_v30 = vld [vmem:[%s4292_s4 + $0x98] sm:$0xff]  ;;  %v1092_v33 = vld [vmem:[%s4292_s4 + $0x80] sm:$0xff]  ;;  %v1086_v52 = vld [vmem:[%s4292_s4 + $0x50] sm:$0xff] }
 0x21f   : > { %1065 = vst [vmem:[#allocation1 + $0x9] sm:$0xff] %v1034_v34  ;;  %1380 = vmatpush.msra.mxu2 %v1088_v39  ;;  %v1044_v46 = vrot.slane %v1034_v34, 7  ;;  %v1111_v31 = vld [vmem:[%s4292_s4 + $0x118] sm:$0xff]  ;;  %v1108_v34 = vld [vmem:[%s4292_s4 + $0x100] sm:$0xff]  ;;  %v1102_v39 = vld [vmem:[%s4292_s4 + $0xd0] sm:$0xff] }
 0x220   : > { %1064 = vst [vmem:[#allocation1] sm:$0xff] %v1033_v37  ;;  %v1028_v40 = vadd.f32 %v1024_v16, %v1018_v38  ;;  %v1042_v63 = vrot.slane %v1033_v37, 7  ;;  %v1110_v16 = vld [vmem:[%s4292_s4 + $0x110] sm:$0xff]  ;;  %v1105_v37 = vld [vmem:[%s4292_s4 + $0xe8] sm:$0xff]  ;;  %v2611_v38 = vld [vmem:[%s4292_s4 + $0x480] sm:$0xff] }
 0x221   : > { %1381 = vmatpush.msra.mxu2 %v1085_v43  ;;  %v1083_v43 = vld [vmem:[%s4292_s4 + $0x38] sm:$0xff] }
 0x222   : > { %v1032_v42 = vmax.f32 %v1028_v40, 0.0 }
 0x223   : > { %v956_v44 = vpop.permute.xlu1 %955  ;;  %1382 = vmatpush.msra.mxu2 %v1082_v51  ;;  %v2618_v51 = vld [vmem:[%s4292_s4 + $0x4b8] sm:$0xff] }
 0x224   : > { %v1041_v47 = vrot.slane %v1032_v42, 7  ;;  %v964_v48 = vsel %vm963_vm5, %v956_v44, %v958_v28  ;;  %v2608_v42 = vld [vmem:[%s4292_s4 + $0x468] sm:$0xff] }
 0x225   : > { %v970_v50 = vmax.f32 %v3160_v12, %v964_v48  ;;  %1383 = vmatpush.msra.mxu2 %v1079_v59  ;;  %v1080_v48 = vld [vmem:[%s4292_s4 + $0x20] sm:$0xff] }
 0x226   : > { %v1045_v56 = vsel %vm1039_vm7, %v1041_v47, %v1044_v46  ;;  %1052 = vst.msk [vmem:[#allocation3 + $0x8] sm:$0xfe] %vm1051_vm8, %v1041_v47  ;;  %v2621_v46 = vld [vmem:[%s4292_s4 + $0x4d0] sm:$0xff]  ;;  %v2599_v59 = vld [vmem:[%s4292_s4 + $0x420] sm:$0xff]  ;;  %vm1895_vm8 = vcmask 195584  }
 0x227   : > { %1055 = vst.msk [vmem:[#allocation3 + $0x18] sm:$0x7f] %vm1054_vm9, %v1045_v56  ;;  %v1067_v57 = vld [vmem:[#allocation1 + $0x5] ss:$9 sm:$0xff]  ;;  %v1017_v58 = vmax.f32 %v970_v50, %v1005_v55  ;;  %1384 = vmatpush.msra.mxu2 %v1076_v60  ;;  %vm1909_vm9 = vcmask 293888  }
 0x228   : > { %1070 = vst.msk [vmem:[#allocation3 + $0x17] ss:$8 sm:$0x3] %vm3351_vm10, %v1067_v57  ;;  %v1096_v50 = vld [vmem:[%s4292_s4 + $0xa0] sm:$0xff]  ;;  %v2602_v55 = vld [vmem:[%s4292_s4 + $0x438] sm:$0xff]  ;;  %v1077_v56 = vld [vmem:[%s4292_s4 + $0x8] sm:$0xff] }
 0x229   : > { %v1027_v12 = vadd.f32 %v1023_v21, %v1017_v58  ;;  %v1129_v21 = vld [vmem:[%s4292_s4 + $0x1a8] sm:$0xf]  ;;  %v2615_v58 = vld [vmem:[%s4292_s4 + $0x4a0] sm:$0xff]  ;;  %v1090_v60 = vld [vmem:[%s4292_s4 + $0x70] sm:$0xff] }
 0x22a   : > { %v1093_v57 = vld [vmem:[%s4292_s4 + $0x88] sm:$0xff] }
 0x22b   : > { %v1031_v62 = vmax.f32 %v1027_v12, 0.0  ;;  %v2626_v12 = vld [vmem:[%s4292_s4 + $0x4f8] sm:$0xf] }
 0x22d   : > { %v1040_v0 = vrot.slane %v1031_v62, 7  ;;  %v1056_v1 = vsel %vm1039_vm7, %v1031_v62, %v1041_v47  ;;  %v1131_v2 = vld [vmem:[#allocation3 + $0x8] sm:$0xfe]  ;;  %v2612_v62 = vld [vmem:[%s4292_s4 + $0x488] sm:$0xff] }
 0x22e   : > { %1062 = vst.msk [vmem:[#allocation3] ss:$8 sm:$0x3] %vm3351_vm10, %v1056_v1  ;;  %v1133_v3 = vld [vmem:[#allocation3 + $0x18] sm:$0x7f]  ;;  %v1197_v54 = vrot.slane %v1131_v2, 1 }
 0x22f   : > { %v1043_v4 = vsel %vm1039_vm7, %v1040_v0, %v1042_v63  ;;  %1050 = vst [vmem:[#allocation3] sm:$0xfe] %v1040_v0  ;;  %v3373_v5 = vrot.slane %v1133_v3, 1  ;;  %v3485_v40 = vld [vmem:[#allocation3 + $0x18] sm:$0x3f]  ;;  %v2605_v47 = vld [vmem:[%s4292_s4 + $0x450] sm:$0xff] }
 0x230   : > { %1053 = vst [vmem:[#allocation3 + $0x10] sm:$0x7f] %v1043_v4  ;;  %v2596_v63 = vld [vmem:[%s4292_s4 + $0x408] sm:$0xff]  ;;  %v2623_v0 = vld [vmem:[%s4292_s4 + $0x4e0] sm:$0xff]  ;;  %v1087_v2 = vld [vmem:[%s4292_s4 + $0x58] sm:$0xff] }
 0x231   : > { %v1199_v8 = vsel %vm1193_vm11, %v1197_v54, %v3373_v5  ;;  %v2609_v3 = vld [vmem:[%s4292_s4 + $0x470] sm:$0xff]  ;;  %v2622_v54 = vld [vmem:[%s4292_s4 + $0x4d8] sm:$0xff] }
 0x232   : > { %2558 = vmatmul.msk.f32.vlgmr.msra.gmra.mxu1 %vm1202_vm12, %v1199_v8  ;;  %2561 = vmatmul.msk.f32.vlgmr.msrb.gmra.mxu3 %vm1202_vm12, %v1199_v8  ;;  %v2593_v4 = vld [vmem:[%s4292_s4 + $0x3f0] sm:$0xff] }
 0x233   : > { %1415 = vmatpush.msra.mxu1 %v1122_v6  ;;  %2569 = vmatpush.msk.msrb.mxu3 %vm497_vm0, %v1128_v7  ;;  %v2606_v6 = vld [vmem:[%s4292_s4 + $0x458] sm:$0xff]  ;;  %v2619_v7 = vld [vmem:[%s4292_s4 + $0x4c0] sm:$0xff] }
 0x235   : > { %1416 = vmatpush.msra.mxu1 %v1119_v9  ;;  %1453 = vmatpush.msrb.mxu3 %v1125_v61  ;;  %v3440_v28 = vld [vmem:[#allocation3 + $0x8] sm:$0xff]  ;;  %v1081_v9 = vld [vmem:[%s4292_s4 + $0x28] sm:$0xff]  ;;  %v2603_v61 = vld [vmem:[%s4292_s4 + $0x440] sm:$0xff] }
 0x236   : > { %v1130_v13 = vld [vmem:[#allocation3] sm:$0xfe] }
 0x237   : > { %1417 = vmatpush.msra.mxu1 %v1116_v10  ;;  %v1132_v14 = vld [vmem:[#allocation3 + $0x10] sm:$0x7f]  ;;  %v1194_v15 = vrot.slane %v1130_v13, 1  ;;  %v3495_v44 = vld [vmem:[#allocation3] sm:$0xff]  ;;  %v1078_v13 = vld [vmem:[%s4292_s4 + $0x10] sm:$0xff] }
 0x238   : > { %v3401_v17 = vrot.slane %v1132_v14, 1  ;;  %v3550_v1 = vld [vmem:[#allocation3 + $0x10] sm:$0x3f]  ;;  %v2616_v10 = vld [vmem:[%s4292_s4 + $0x4a8] sm:$0xff] }
 0x239   : > { %1418 = vmatpush.msra.mxu1 %v1113_v11  ;;  %v2587_v11 = vld [vmem:[%s4292_s4 + $0x3c0] sm:$0xff]  ;;  %v2600_v14 = vld [vmem:[%s4292_s4 + $0x428] sm:$0xff] }
 0x23a   : > { %2559 = vmatmul.msk.f32.gmra.mxu1 %vm1202_vm12, %v3373_v5  ;;  %2562 = vmatmul.msk.f32.gmra.mxu3 %vm1202_vm12, %v3373_v5  ;;  %v1196_v19 = vsel %vm1193_vm11, %v1194_v15, %v3401_v17  ;;  %v2613_v15 = vld [vmem:[%s4292_s4 + $0x490] sm:$0xff] }
 0x23b   : > { %1419 = vmatpush.msra.mxu1 %v1110_v16  ;;  %1232 = vmatmul.f32.vlgmr.msrb.gmra.mxu0 %v1196_v19  ;;  %v2584_v16 = vld [vmem:[%s4292_s4 + $0x3a8] sm:$0xff] }
 0x23c   : > { %1278 = vmatmul.f32.vlgmr.msrb.gmra.mxu2 %v1196_v19  ;;  %1461 = vmatpush.msrb.mxu0 %v1123_v18  ;;  %v2597_v18 = vld [vmem:[%s4292_s4 + $0x410] sm:$0xff] }
 0x23d   : > { %1420 = vmatpush.msra.mxu1 %v1107_v20  ;;  %2572 = vmatpush.msk.msrb.mxu2 %vm497_vm0, %v1129_v21  ;;  %v1507_v20 = vld [vmem:[#allocation3] sm:$0xfc]  ;;  %v2581_v21 = vld [vmem:[%s4292_s4 + $0x390] sm:$0xff] }
 0x23e   : > { %1462 = vmatpush.msrb.mxu0 %v1120_v53  ;;  %v1509_v53 = vld [vmem:[#allocation3 + $0x10] sm:$0xff] }
 0x23f   : > { %1421 = vmatpush.msra.mxu1 %v1104_v22  ;;  %1499 = vmatpush.msrb.mxu2 %v1126_v23  ;;  %v3618_v22 = vld [vmem:[%s4292_s4 + $0x500] sm:$0xf]  ;;  %v2594_v23 = vld [vmem:[%s4292_s4 + $0x3f8] sm:$0xff] }
 0x240   : > { %1463 = vmatpush.msrb.mxu0 %v1117_v25  ;;  %v2607_v25 = vld [vmem:[%s4292_s4 + $0x460] sm:$0xff] }
 0x241   : > { %1422 = vmatpush.msra.mxu1 %v1101_v26  ;;  %v1508_v26 = vld [vmem:[#allocation3 + $0x8] sm:$0xfc] }
 0x242   : > { %2564 = vmatmul.msk.f32.vlgmr.msrb.gmra.mxu1 %vm1202_vm12, %v1199_v8  ;;  %2567 = vmatmul.msk.f32.vlgmr.msra.gmra.mxu3 %vm1202_vm12, %v3440_v28  ;;  %v2590_v8 = vld [vmem:[%s4292_s4 + $0x3d8] sm:$0xff] }
 0x243   : > { %1423 = vmatpush.msra.mxu1 %v1098_v24  ;;  %1464 = vmatpush.msrb.mxu0 %v1114_v27  ;;  %v2578_v24 = vld [vmem:[%s4292_s4 + $0x378] sm:$0xff] }
 0x244   : > { %1235 = vmatmul.f32.gmra.mxu0 %v3401_v17  ;;  %1281 = vmatmul.f32.gmra.mxu2 %v3401_v17 }
 0x245   : > { %1592 = vmatpush.msra.mxu3 %v2620_v29  ;;  %1424 = vmatpush.msra.mxu1 %v1095_v30  ;;  %v2591_v29 = vld [vmem:[%s4292_s4 + $0x3e0] sm:$0xff]  ;;  %v2604_v30 = vld [vmem:[%s4292_s4 + $0x448] sm:$0xff] }
 0x246   : > { %1465 = vmatpush.msrb.mxu0 %v1111_v31  ;;  %v1571_v31 = vrot.slane %v1507_v20, 2 }
 0x247   : > { %1593 = vmatpush.msra.mxu3 %v2617_v32  ;;  %1425 = vmatpush.msra.mxu1 %v1092_v33  ;;  %v1572_v32 = vrot.slane %v1509_v53, 2  ;;  %v2575_v33 = vld [vmem:[%s4292_s4 + $0x360] sm:$0xff] }
 0x248   : > { %1466 = vmatpush.msrb.mxu0 %v1108_v34  ;;  %v1574_v34 = vrot.slane %v1508_v26, 2 }
 0x249   : > { %1594 = vmatpush.msra.mxu3 %v2614_v35  ;;  %1426 = vmatpush.msra.mxu1 %v1089_v36  ;;  %v2588_v35 = vld [vmem:[%s4292_s4 + $0x3c8] sm:$0xff] }
 0x24a   : > { %1467 = vmatpush.msrb.mxu0 %v1105_v37  ;;  %2565 = vmatmul.msk.f32.gmra.mxu1 %vm1202_vm12, %v3373_v5  ;;  %v1084_v5 = vld [vmem:[%s4292_s4 + $0x40] sm:$0xff]  ;;  %v2601_v37 = vld [vmem:[%s4292_s4 + $0x430] sm:$0xff] }
 0x24b   : > { %1595 = vmatpush.msra.mxu3 %v2611_v38  ;;  %1427 = vmatpush.msra.mxu1 %v1086_v52  ;;  %v1573_v38 = vsel %vm1570_vm13, %v1571_v31, %v1572_v32  ;;  %v2628_v52 = vld [vmem:[%s4292_s4 + $0x508] sm:$0xf] }
 0x24c   : > { %2568 = vmatmul.msk.f32.gmra.mxu3 %vm1202_vm12, %v3485_v40  ;;  %1468 = vmatpush.msrb.mxu0 %v1102_v39  ;;  %v2585_v39 = vld [vmem:[%s4292_s4 + $0x3b0] sm:$0xff] }
 0x24d   : > { %1324 = vmatmul.f32.vlgmr.msra.gmra.mxu0 %v1196_v19  ;;  %1385 = vmatmul.f32.vlgmr.msra.gmra.mxu2 %v3495_v44  ;;  %v2610_v19 = vld [vmem:[%s4292_s4 + $0x478] sm:$0xff] }
 0x24e   : > { %1596 = vmatpush.msra.mxu3 %v2608_v42  ;;  %1428 = vmatpush.msra.mxu1 %v1083_v43  ;;  %v2598_v42 = vld [vmem:[%s4292_s4 + $0x418] sm:$0xff]  ;;  %v2625_v43 = vld [vmem:[%s4292_s4 + $0x4f0] sm:$0xff] }
 0x24f   : > { %1469 = vmatpush.msrb.mxu0 %v1099_v45  ;;  %1638 = vmatpush.msra.mxu2 %v2621_v46  ;;  %v2595_v45 = vld [vmem:[%s4292_s4 + $0x400] sm:$0xff] }
 0x250   : > { %1597 = vmatpush.msra.mxu3 %v2605_v47  ;;  %1429 = vmatpush.msra.mxu1 %v1080_v48  ;;  %v2579_v46 = vld [vmem:[%s4292_s4 + $0x380] sm:$0xff]  ;;  %v2576_v47 = vld [vmem:[%s4292_s4 + $0x368] sm:$0xff]  ;;  %v2589_v48 = vld [vmem:[%s4292_s4 + $0x3d0] sm:$0xff] }
 0x251   : > { %1470 = vmatpush.msrb.mxu0 %v1096_v50  ;;  %1639 = vmatpush.msra.mxu2 %v2618_v51  ;;  %v2586_v50 = vld [vmem:[%s4292_s4 + $0x3b8] sm:$0xff]  ;;  %v2583_v51 = vld [vmem:[%s4292_s4 + $0x3a0] sm:$0xff] }
 0x252   : > { %1598 = vmatpush.msra.mxu3 %v2602_v55  ;;  %1430 = vmatpush.msra.mxu1 %v1077_v56  ;;  %v2580_v55 = vld [vmem:[%s4292_s4 + $0x388] sm:$0xff]  ;;  %v2577_v56 = vld [vmem:[%s4292_s4 + $0x370] sm:$0xff] }
 0x253   : > { %1471 = vmatpush.msrb.mxu0 %v1093_v57  ;;  %1640 = vmatpush.msra.mxu2 %v2615_v58 }
 0x254   : > { %1599 = vmatpush.msra.mxu3 %v2599_v59  ;;  %2629 = vmatpush.msk.msrb.mxu1 %vm497_vm0, %v2626_v12 }
 0x255   : > { %1431 = vmatmul.f32.vlgmr.msra.gmra.mxu1 %v3495_v44  ;;  %2570 = vmatmul.msk.f32.vlgmr.msrb.gmra.mxu3 %vm1202_vm12, %v3440_v28 }
 0x256   : > { %1472 = vmatpush.msrb.mxu0 %v1090_v60  ;;  %1641 = vmatpush.msra.mxu2 %v2612_v62 }
 0x257   : > { %1327 = vmatmul.f32.gmra.mxu0 %v3401_v17  ;;  %1388 = vmatmul.f32.gmra.mxu2 %v3550_v1  ;;  %v1510_v17 = vld [vmem:[#allocation3 + $0x18] sm:$0xff] }
 0x258   : > { %1600 = vmatpush.msra.mxu3 %v2596_v63  ;;  %1630 = vmatpush.msrb.mxu1 %v2623_v0  ;;  %v3631_v27 = vrot.slane %v1510_v17, 2 }
 0x259   : > { %1473 = vmatpush.msrb.mxu0 %v1087_v2  ;;  %1642 = vmatpush.msra.mxu2 %v2609_v3 }
 0x25a   : > { %1684 = vmatpush.msra.mxu1 %v2622_v54  ;;  %1601 = vmatpush.msra.mxu3 %v2593_v4  ;;  %v1576_v36 = vsel %vm1570_vm13, %v1574_v34, %v3631_v27 }
 0x25b   : > { %1474 = vmatpush.msrb.mxu0 %v1084_v5  ;;  %1643 = vmatpush.msra.mxu2 %v2606_v6 }
 0x25c   : > { %1685 = vmatpush.msra.mxu1 %v2619_v7  ;;  %1602 = vmatpush.msra.mxu3 %v2590_v8 }
 0x25d   : > { %1475 = vmatpush.msrb.mxu0 %v1081_v9  ;;  %1644 = vmatpush.msra.mxu2 %v2603_v61 }
 0x25e   : > { %1686 = vmatpush.msra.mxu1 %v2616_v10  ;;  %1603 = vmatpush.msra.mxu3 %v2587_v11 }
 0x25f   : > { %1434 = vmatmul.f32.gmra.mxu1 %v3550_v1  ;;  %2571 = vmatmul.msk.f32.gmra.mxu3 %vm1202_vm12, %v3485_v40 }
 0x260   : > { %1476 = vmatpush.msrb.mxu0 %v1078_v13  ;;  %1645 = vmatpush.msra.mxu2 %v2600_v14 }
 0x261   : > { %1687 = vmatpush.msra.mxu1 %v2613_v15  ;;  %1477 = vmatmul.f32.vlgmr.msrb.gmra.mxu0 %v3495_v44  ;;  %v2582_v44 = vld [vmem:[%s4292_s4 + $0x398] sm:$0xff] }
 0x262   : > { %2573 = vmatmul.msk.f32.vlgmr.msrb.gmra.mxu2 %vm1202_vm12, %v3440_v28  ;;  %1604 = vmatpush.msra.mxu3 %v2584_v16  ;;  %v2624_v28 = vld [vmem:[%s4292_s4 + $0x4e8] sm:$0xff] }
 0x263   : > { %1646 = vmatpush.msra.mxu2 %v2597_v18  ;;  %1688 = vmatpush.msra.mxu1 %v2610_v19 }
 0x264   : > { %1605 = vmatpush.msra.mxu3 %v2581_v21  ;;  %2632 = vmatpush.msk.msra.mxu0 %vm497_vm0, %v3618_v22 }
 0x265   : > { %1647 = vmatpush.msra.mxu2 %v2594_v23  ;;  %1689 = vmatpush.msra.mxu1 %v2607_v25 }
 0x266   : > { %1606 = vmatpush.msra.mxu3 %v2578_v24  ;;  %1676 = vmatpush.msra.mxu0 %v2624_v28 }
 0x267   : > { %1648 = vmatpush.msra.mxu2 %v2591_v29  ;;  %1690 = vmatpush.msra.mxu1 %v2604_v30  ;;  %v1736_v30 = vld [vmem:[%s4293_s5] sm:$0xff] }
 0x268   : > { %1607 = vmatpush.msra.mxu3 %v2575_v33  ;;  %2630 = vmatmul.msk.f32.vlgmr.msrb.gmra.mxu1 %vm1202_vm12, %v1576_v36 }
 0x269   : > { %1608 = vmatmul.f32.vlgmr.msra.gmra.mxu3 %v1573_v38  ;;  %1649 = vmatpush.msra.mxu2 %v2588_v35 }
 0x26a   : > { %1691 = vmatpush.msra.mxu1 %v2601_v37  ;;  %1480 = vmatmul.f32.gmra.mxu0 %v3550_v1 }
 0x26b   : > { %2574 = vmatmul.msk.f32.gmra.mxu2 %vm1202_vm12, %v3485_v40  ;;  %2635 = vmatpush.msk.msrb.mxu3 %vm497_vm0, %v2628_v52  ;;  %v2592_v40 = vld [vmem:[%s4292_s4 + $0x3e8] sm:$0xff] }
 0x26c   : > { %1650 = vmatpush.msra.mxu2 %v2585_v39  ;;  %1692 = vmatpush.msra.mxu1 %v2598_v42 }
 0x26d   : > { %1722 = vmatpush.msrb.mxu3 %v2625_v43 }
 0x26e   : > { %1651 = vmatpush.msra.mxu2 %v2582_v44  ;;  %1693 = vmatpush.msra.mxu1 %v2595_v45 }
 0x270   : > { %1652 = vmatpush.msra.mxu2 %v2579_v46  ;;  %1694 = vmatpush.msra.mxu1 %v2592_v40 }
 0x271   : > { %1611 = vmatmul.f32.gmra.mxu3 %v1572_v32  ;;  %2631 = vmatmul.msk.f32.gmra.mxu1 %vm1202_vm12, %v3631_v27 }
 0x272   : > { %1653 = vmatpush.msra.mxu2 %v2576_v47  ;;  %1695 = vmatpush.msra.mxu1 %v2589_v48 }
 0x273   : > { %1654 = vmatmul.f32.vlgmr.msra.gmra.mxu2 %v1573_v38  ;;  %2633 = vmatmul.msk.f32.vlgmr.msra.gmra.mxu0 %vm1202_vm12, %v1576_v36 }
 0x274   : > { %1696 = vmatpush.msra.mxu1 %v2586_v50  ;;  %2660 = vmatpush.msk.msrb.mxu2 %vm497_vm0, %v3618_v22 }
 0x276   : > { %1697 = vmatpush.msra.mxu1 %v2583_v51  ;;  %2661 = vmatpush.msrb.mxu2 %v2624_v28 }
 0x278   : > { %1698 = vmatpush.msra.mxu1 %v2580_v55 }
 0x279   : > { %2636 = vmatmul.msk.f32.vlgmr.msrb.gmra.mxu3 %vm1202_vm12, %v1576_v36 }
 0x27a   : > { %1699 = vmatpush.msra.mxu1 %v2577_v56 }
 0x27b   : > { %1657 = vmatmul.f32.gmra.mxu2 %v1572_v32  ;;  %1700 = vmatmul.f32.vlgmr.msra.gmra.mxu1 %v1573_v38  ;;  %v1737_v38 = vld [vmem:[%s4293_s5 + $0x8] sm:$0x3f] }
 0x281   : > { %2637 = vmatmul.msk.f32.gmra.mxu3 %vm1202_vm12, %v3631_v27 }
 0x283   : > { %2634 = vmatmul.msk.f32.vlgmr.msrb.gmra.mxu2 %vm1202_vm12, %v3631_v27  ;;  %1703 = vmatmul.f32.gmra.mxu1 %v1572_v32 }
 0x2af   : > { %v1256_v57 = vpop.f32.mrf.mxu1 }
 0x2b5   : > { %v1302_v58 = vpop.f32.mrf.mxu3 }
 0x2b7   : > { %v1259_v59 = vpop.f32.mrf.mxu1 }
 0x2b8   : > { %v1233_v2 = vpop.f32.mrf.mxu0 }
 0x2b9   : > { %v1257_v18 = vadd.f32 %v1256_v57, %v1233_v2 }
 0x2bd   : > { %v1305_v12 = vpop.f32.mrf.mxu3 }
 0x2bf   : > { %v1279_v60 = vpop.f32.mrf.mxu2  ;;  %v1348_v62 = vpop.f32.mrf.mxu1 }
 0x2c0   : > { %v1303_v52 = vadd.f32 %v1302_v58, %v1279_v60 }
 0x2c1   : > { %v1236_v5 = vpop.f32.mrf.mxu0 }
 0x2c2   : > { %v1260_v16 = vadd.f32 %v1259_v59, %v1236_v5 }
 0x2c5   : > { %v1409_v63 = vpop.f32.mrf.mxu3 }
 0x2c7   : > { %v1282_v0 = vpop.f32.mrf.mxu2  ;;  %v1351_v1 = vpop.f32.mrf.mxu1 }
 0x2c8   : > { %v1306_v35 = vadd.f32 %v1305_v12, %v1282_v0 }
 0x2ca   : > { %v1325_v9 = vpop.f32.mrf.mxu0 }
 0x2cb   : > { %v1349_v36 = vadd.f32 %v1348_v62, %v1325_v9 }
 0x2cf   : > { %v1412_v3 = vpop.f32.mrf.mxu3 }
 0x2d0   : > { %v1386_v54 = vpop.f32.mrf.mxu2 }
 0x2d1   : > { %v1387_v21 = vadd.f32 %v1386_v54, %v1257_v18 }
 0x2d2   : > { %v1432_v4 = vpop.f32.mrf.mxu1 }
 0x2d3   : > { %v1410_v24 = vadd.f32 %v1409_v63, %v1387_v21  ;;  %v1433_v47 = vadd.f32 %v1432_v4, %v1303_v52  ;;  %v1989_v52 = vld [vmem:[%s4295_s7 + $0xf0] sm:$0xff] }
 0x2d4   : > { %v1328_v13 = vpop.f32.mrf.mxu0 }
 0x2d5   : > { %v1352_v34 = vadd.f32 %v1351_v1, %v1328_v13 }
 0x2d8   : > { %v1455_v6 = vpop.f32.mrf.mxu3 }
 0x2d9   : > { %v1456_v12 = vadd.f32 %v1455_v6, %v1433_v47  ;;  %v1970_v47 = vld [vmem:[%s4295_s7 + $0x58] sm:$0xff] }
 0x2da   : > { %v1389_v7 = vpop.f32.mrf.mxu2 }
 0x2db   : > { %v1390_v19 = vadd.f32 %v1389_v7, %v1260_v16  ;;  %v1859_v7 = vld [vmem:[%s4294_s6] sm:$0x3] }
 0x2dc   : > { %v1435_v8 = vpop.f32.mrf.mxu1 }
 0x2dd   : > { %v1413_v22 = vadd.f32 %v1412_v3, %v1390_v19  ;;  %v1436_v39 = vadd.f32 %v1435_v8, %v1306_v35  ;;  %v1974_v35 = vld [vmem:[%s4295_s7 + $0x78] sm:$0xff] }
 0x2de   : > { %v1478_v20 = vpop.f32.mrf.mxu0 }
 0x2df   : > { %v1479_v44 = vadd.f32 %v1478_v20, %v1349_v36  ;;  %v1990_v36 = vld [vmem:[%s4295_s7 + $0xf8] sm:$0xff] }
 0x2e0   : > { %2125 = vmatpush.msrb.mxu1 %v1990_v36  ;;  %v2041_v36 = vld [vmem:[%s4295_s7 + $0x290] sm:$0xff] }
 0x2e2   : > { %v1458_v61 = vpop.f32.mrf.mxu3  ;;  %2126 = vmatpush.msrb.mxu1 %v1989_v52  ;;  %v2069_v52 = vld [vmem:[%s4295_s7 + $0x370] sm:$0xff] }
 0x2e3   : > { %v1459_v48 = vadd.f32 %v1458_v61, %v1436_v39  ;;  %v2005_v39 = vld [vmem:[%s4295_s7 + $0x170] sm:$0xff] }
 0x2e5   : > { %v1501_v10 = vpop.f32.mrf.mxu2  ;;  %v1632_v11 = vpop.f32.mrf.mxu1 }
 0x2e6   : > { %v1502_v55 = vadd.f32 %v1501_v10, %v1479_v44  ;;  %v1862_v10 = vperm.slane %v1859_v7, 1  ;;  %v2004_v44 = vld [vmem:[%s4295_s7 + $0x168] sm:$0xff] }
 0x2e7   : > { %v1481_v31 = vpop.f32.mrf.mxu0 }
 0x2e8   : > { %v1482_v37 = vadd.f32 %v1481_v31, %v1352_v34 }
 0x2ec   : > { %v1609_v14 = vpop.f32.mrf.mxu3 }
 0x2ed   : > { %v1633_v23 = vadd.f32 %v1632_v11, %v1609_v14 }
 0x2ee   : > { %v1504_v15 = vpop.f32.mrf.mxu2  ;;  %v1635_v17 = vpop.f32.mrf.mxu1 }
 0x2ef   : > { %v1730_v28 = vadd.f32 %v1633_v23, %v1410_v24  ;;  %v1505_v45 = vadd.f32 %v1504_v15, %v1482_v37  ;;  %v1861_v23 = vperm.slane %v1859_v7, 0  ;;  %v2006_v37 = vld [vmem:[%s4295_s7 + $0x178] sm:$0xff]  ;;  %v1997_v7 = vld [vmem:[%s4295_s7 + $0x130] sm:$0xff] }
 0x2f0   : > { %v1678_v50 = vpop.f32.mrf.mxu0 }
 0x2f4   : > { %v1612_v53 = vpop.f32.mrf.mxu3 }
 0x2f5   : > { %v1636_v25 = vadd.f32 %v1635_v17, %v1612_v53 }
 0x2f6   : > { %v1655_v26 = vpop.f32.mrf.mxu2 }
 0x2f7   : > { %v1733_v27 = vadd.f32 %v1636_v25, %v1413_v22  ;;  %v1679_v56 = vadd.f32 %v1678_v50, %v1655_v26  ;;  %v2002_v50 = vld [vmem:[%s4295_s7 + $0x158] sm:$0xff] }
 0x2f8   : > { %v1701_v29 = vpop.f32.mrf.mxu1 }
 0x2f9   : > { %2638 = vmatpush.msk.msrb.mxu0 %vm1570_vm13, %v1733_v27  ;;  %v1731_v60 = vadd.f32 %v1679_v56, %v1456_v12  ;;  %v2001_v56 = vld [vmem:[%s4295_s7 + $0x150] sm:$0xff]  ;;  %v1984_v12 = vld [vmem:[%s4295_s7 + $0xc8] sm:$0xff] }
 0x2fb   : > { %1769 = vmatpush.msrb.mxu0 %v1730_v28 }
 0x2fc   : > { %v1724_v32 = vpop.f32.mrf.mxu3  ;;  %2639 = vmatmul.msk.f32.vlgmr.msrb.gmra.mxu0 %vm1738_vm14, %v1736_v30 }
 0x2fd   : > { %v1725_v46 = vadd.f32 %v1724_v32, %v1701_v29  ;;  %2105 = vmatpush.msra.mxu0 %v1974_v35  ;;  %v2025_v35 = vld [vmem:[%s4295_s7 + $0x210] sm:$0xff] }
 0x2fe   : > { %v1658_v33 = vpop.f32.mrf.mxu2 }
 0x2ff   : > { %v1732_v62 = vadd.f32 %v1725_v46, %v1502_v55  ;;  %v1987_v46 = vld [vmem:[%s4295_s7 + $0xe0] sm:$0xff]  ;;  %v1985_v55 = vld [vmem:[%s4295_s7 + $0xd0] sm:$0xff] }
 0x300   : > { %v1704_v42 = vpop.f32.mrf.mxu1 }
 0x304   : > { %v1727_v43 = vpop.f32.mrf.mxu3  ;;  %2640 = vmatmul.msk.f32.gmra.mxu0 %vm1738_vm14, %v1737_v38 }
 0x305   : > { %v1728_v40 = vadd.f32 %v1727_v43, %v1704_v42  ;;  %v1972_v42 = vld [vmem:[%s4295_s7 + $0x68] sm:$0xff] }
 0x306   : > { %v1681_v51 = vpop.f32.mrf.mxu2  ;;  %v1988_v43 = vld [vmem:[%s4295_s7 + $0xe8] sm:$0xff] }
 0x307   : > { %v1735_v57 = vadd.f32 %v1728_v40, %v1505_v45  ;;  %v1682_v59 = vadd.f32 %v1681_v51, %v1658_v33  ;;  %v1971_v45 = vld [vmem:[%s4295_s7 + $0x60] sm:$0xff]  ;;  %2127 = vmatpush.msrb.mxu1 %v1988_v43  ;;  %v1969_v51 = vld [vmem:[%s4295_s7 + $0x50] sm:$0xff]  ;;  %v2052_v43 = vld [vmem:[%s4295_s7 + $0x2e8] sm:$0xff] }
 0x308   : > { %v2003_v40 = vld [vmem:[%s4295_s7 + $0x160] sm:$0xff] }
 0x309   : > { %v1734_v58 = vadd.f32 %v1682_v59, %v1459_v48  ;;  %2644 = vmatpush.msk.msra.mxu3 %vm1570_vm13, %v1735_v57  ;;  %2128 = vmatpush.msrb.mxu1 %v1987_v46  ;;  %v1986_v48 = vld [vmem:[%s4295_s7 + $0xd8] sm:$0xff]  ;;  %v1968_v59 = vld [vmem:[%s4295_s7 + $0x48] sm:$0xff]  ;;  %v2009_v46 = vld [vmem:[%s4295_s7 + $0x190] sm:$0xff] }
 0x30a   : > { %v2022_v57 = vld [vmem:[%s4295_s7 + $0x1f8] sm:$0xff] }
 0x30b   : > { %2641 = vmatpush.msk.msra.mxu2 %vm1570_vm13, %v1734_v58  ;;  %1815 = vmatpush.msra.mxu3 %v1732_v62  ;;  %v2021_v62 = vld [vmem:[%s4295_s7 + $0x1f0] sm:$0xff]  ;;  %v2000_v58 = vld [vmem:[%s4295_s7 + $0x148] sm:$0xff]  ;;  %vm4161_vm13 = vcmp.lt.s32.totalorder %v1058_v41, 188 }
 0x30c   : > { %2645 = vmatmul.msk.f32.vlgmr.msra.gmra.mxu3 %vm1738_vm14, %v1736_v30  ;;  %2129 = vmatpush.msrb.mxu1 %v1986_v48  ;;  %v2051_v48 = vld [vmem:[%s4295_s7 + $0x2e0] sm:$0xff] }
 0x30d   : > { %1792 = vmatpush.msra.mxu2 %v1731_v60  ;;  %2165 = vmatpush.msrb.mxu3 %v2022_v57  ;;  %v2020_v60 = vld [vmem:[%s4295_s7 + $0x1e8] sm:$0xff]  ;;  %v2050_v57 = vld [vmem:[%s4295_s7 + $0x2d8] sm:$0xff] }
 0x30e   : > { %2642 = vmatmul.msk.f32.vlgmr.msra.gmra.mxu2 %vm1738_vm14, %v1736_v30  ;;  %2130 = vmatpush.msrb.mxu1 %v1985_v55 }
 0x30f   : > { %2145 = vmatpush.msrb.mxu2 %v2006_v37  ;;  %2166 = vmatpush.msrb.mxu3 %v2021_v62  ;;  %v2037_v37 = vld [vmem:[%s4295_s7 + $0x270] sm:$0xff] }
 0x310   : > { %2131 = vmatpush.msrb.mxu1 %v1984_v12  ;;  %v2007_v12 = vld [vmem:[%s4295_s7 + $0x180] sm:$0xff] }
 0x311   : > { %2146 = vmatpush.msrb.mxu2 %v2005_v39  ;;  %2167 = vmatpush.msrb.mxu3 %v2020_v60  ;;  %v2010_v39 = vld [vmem:[%s4295_s7 + $0x198] sm:$0xff]  ;;  %v2049_v60 = vld [vmem:[%s4295_s7 + $0x2d0] sm:$0xff] }
 0x313   : > { %2147 = vmatpush.msrb.mxu2 %v2004_v44 }
 0x314   : > { %2646 = vmatmul.msk.f32.gmra.mxu3 %vm1738_vm14, %v1737_v38 }
 0x315   : > { %2148 = vmatpush.msrb.mxu2 %v2003_v40 }
 0x316   : > { %2643 = vmatmul.msk.f32.gmra.mxu2 %vm1738_vm14, %v1737_v38  ;;  %v1973_v38 = vld [vmem:[%s4295_s7 + $0x70] sm:$0xff]  ;;  %vm1923_vm14 = vcmask 392192  }
 0x317   : > { %2106 = vmatpush.msra.mxu0 %v1973_v38  ;;  %2149 = vmatpush.msrb.mxu2 %v2002_v50  ;;  %v2053_v38 = vld [vmem:[%s4295_s7 + $0x2f0] sm:$0xff]  ;;  %v2067_v50 = vld [vmem:[%s4295_s7 + $0x360] sm:$0xff] }
 0x319   : > { %2107 = vmatpush.msra.mxu0 %v1972_v42  ;;  %2150 = vmatpush.msrb.mxu2 %v2001_v56  ;;  %v2036_v42 = vld [vmem:[%s4295_s7 + $0x268] sm:$0xff]  ;;  %v2034_v56 = vld [vmem:[%s4295_s7 + $0x258] sm:$0xff] }
 0x31b   : > { %2108 = vmatpush.msra.mxu0 %v1971_v45  ;;  %2151 = vmatpush.msrb.mxu2 %v2000_v58  ;;  %v2068_v45 = vld [vmem:[%s4295_s7 + $0x368] sm:$0xff]  ;;  %v2033_v58 = vld [vmem:[%s4295_s7 + $0x250] sm:$0xff] }
 0x31d   : > { %2109 = vmatpush.msra.mxu0 %v1970_v47  ;;  %v2035_v47 = vld [vmem:[%s4295_s7 + $0x260] sm:$0xff] }
 0x31f   : > { %2110 = vmatpush.msra.mxu0 %v1969_v51  ;;  %v2008_v51 = vld [vmem:[%s4295_s7 + $0x188] sm:$0xff] }
 0x321   : > { %2111 = vmatpush.msra.mxu0 %v1968_v59  ;;  %v2066_v59 = vld [vmem:[%s4295_s7 + $0x358] sm:$0xff] }
 0x379   : > { %v1771_v5 = vpop.f32.mrf.mxu0 }
 0x381   : > { %v1774_v16 = vpop.f32.mrf.mxu0 }
 0x38f   : > { %v1817_v63 = vpop.f32.mrf.mxu3 }
 0x390   : > { %1827 = vrot.lane.b32.xlu0 %v1817_v63, %s2772_s21  ;;  %v1967_v63 = vld [vmem:[%s4295_s7 + $0x40] sm:$0xff] }
 0x391   : > { %v1794_v0 = vpop.f32.mrf.mxu2  ;;  %2112 = vmatpush.msra.mxu0 %v1967_v63  ;;  %v2065_v63 = vld [vmem:[%s4295_s7 + $0x350] sm:$0xff] }
 0x392   : > { %1825 = vrot.lane.b32.xlu2 %v1794_v0, %s2772_s21 }
 0x397   : > { %v1820_v1 = vpop.f32.mrf.mxu3 }
 0x399   : > { %v1797_v2 = vpop.f32.mrf.mxu2 }
 0x39a   : > { %1836 = vrot.lane.b32.xlu1 %v1797_v2, %s2772_s21  ;;  %1838 = vrot.lane.b32.xlu2 %v1820_v1, %s2772_s21  ;;  %s2773_s21 = smov 12   ;;  %v1999_v1 = vld [vmem:[%s4295_s7 + $0x140] sm:$0xff] }
 0x39b   : > { %2152 = vmatpush.msrb.mxu2 %v1999_v1 }
 0x3ec   : > { %v1826_v3 = vpop.permute.xlu2 %1825 }
 0x3f4   : > { %v1839_v54 = vpop.permute.xlu2 %1838 }
 0x3f5   : > { %v1844_v4 = vmax.f32 %v1797_v2, %v1839_v54  ;;  %v1966_v2 = vld [vmem:[%s4295_s7 + $0x38] sm:$0xff] }
 0x3f6   : > { %2113 = vmatpush.msra.mxu0 %v1966_v2  ;;  %v2081_v2 = vld [vmem:[%s4295_s7 + $0x3d0] sm:$0xf] }
 0x3f7   : > { %v1853_v9 = vrot.slane %v1844_v4, 7  ;;  %v2019_v4 = vld [vmem:[%s4295_s7 + $0x1e0] sm:$0xff] }
 0x3f8   : > { %2168 = vmatpush.msrb.mxu3 %v2019_v4  ;;  %v2032_v4 = vld [vmem:[%s4295_s7 + $0x248] sm:$0xff] }
 0x402   : > { %v1828_v6 = vpop.permute.xlu0 %1827 }
 0x403   : > { %v1833_v8 = vmax.f32 %v1794_v0, %v1828_v6  ;;  %v1829_v14 = vsel %vm963_vm5, %v1826_v3, %v1828_v6  ;;  %v1983_v0 = vld [vmem:[%s4295_s7 + $0xc0] sm:$0xff]  ;;  %v1982_v3 = vld [vmem:[%s4295_s7 + $0xb8] sm:$0xff]  ;;  %v1981_v6 = vld [vmem:[%s4295_s7 + $0xb0] sm:$0xff] }
 0x404   : > { %v1832_v18 = vmax.f32 %v1771_v5, %v1829_v14  ;;  %2132 = vmatpush.msrb.mxu1 %v1983_v0  ;;  %v1965_v5 = vld [vmem:[%s4295_s7 + $0x30] sm:$0xff]  ;;  %v1979_v14 = vld [vmem:[%s4295_s7 + $0xa0] sm:$0xff] }
 0x405   : > { %v1852_v61 = vrot.slane %v1833_v8, 7  ;;  %2114 = vmatpush.msra.mxu0 %v1965_v5  ;;  %v2048_v5 = vld [vmem:[%s4295_s7 + $0x2c8] sm:$0xff] }
 0x406   : > { %v1849_v53 = vrot.slane %v1832_v18, 7  ;;  %2133 = vmatpush.msrb.mxu1 %v1982_v3  ;;  %v2277_v3 = vld [vmem:[%s4297_s9 + $0x58] sm:$0xff] }
 0x407   : > { %v1854_v11 = vsel %vm1039_vm7, %v1852_v61, %v1853_v9  ;;  %v1964_v9 = vld [vmem:[%s4295_s7 + $0x28] sm:$0xff] }
 0x408   : > { %v1858_v13 = vmax.f32 %v1833_v8, %v1854_v11  ;;  %v2018_v8 = vld [vmem:[%s4295_s7 + $0x1d8] sm:$0xff]  ;;  %2134 = vmatpush.msrb.mxu1 %v1981_v6  ;;  %v1980_v61 = vld [vmem:[%s4295_s7 + $0xa8] sm:$0xff]  ;;  %v2017_v11 = vld [vmem:[%s4295_s7 + $0x1d0] sm:$0xff]  ;;  %2115 = vmatpush.msra.mxu0 %v1964_v9 }
 0x409   : > { %2169 = vmatpush.msrb.mxu3 %v2018_v8  ;;  %v2064_v6 = vld [vmem:[%s4295_s7 + $0x348] sm:$0xff] }
 0x40a   : > { %v1866_v15 = vadd.f32 %v1862_v10, %v1858_v13  ;;  %v1996_v10 = vld [vmem:[%s4295_s7 + $0x128] sm:$0xff]  ;;  %v1963_v13 = vld [vmem:[%s4295_s7 + $0x20] sm:$0xff]  ;;  %2135 = vmatpush.msrb.mxu1 %v1980_v61 }
 0x40b   : > { %2170 = vmatpush.msrb.mxu3 %v2017_v11  ;;  %2116 = vmatpush.msra.mxu0 %v1963_v13  ;;  %v2080_v9 = vld [vmem:[%s4295_s7 + $0x3c8] sm:$0xff]  ;;  %v2031_v61 = vld [vmem:[%s4295_s7 + $0x240] sm:$0xff] }
 0x40c   : > { %v1868_v17 = vmax.f32 %v1866_v15, 0.0  ;;  %v1837_v19 = vpop.permute.xlu1 %1836  ;;  %v1995_v15 = vld [vmem:[%s4295_s7 + $0x120] sm:$0xff]  ;;  %2136 = vmatpush.msrb.mxu1 %v1979_v14 }
 0x40d   : > { %v1840_v20 = vsel %vm963_vm5, %v1837_v19, %v1839_v54  ;;  %v1998_v54 = vld [vmem:[%s4295_s7 + $0x138] sm:$0xff]  ;;  %vm4017_vm5 = vcmp.ge.s32.totalorder %v1058_v41, 36  ;;  %v2063_v13 = vld [vmem:[%s4295_s7 + $0x340] sm:$0xff] }
 0x40e   : > { %1876 = vst [vmem:[#allocation1 + $0x9] sm:$0xff] %v1868_v17  ;;  %v1843_v21 = vmax.f32 %v1774_v16, %v1840_v20  ;;  %v1871_v28 = vrot.slane %v1868_v17, 7  ;;  %2153 = vmatpush.msrb.mxu2 %v1998_v54  ;;  %v2016_v16 = vld [vmem:[%s4295_s7 + $0x1c8] sm:$0xff]  ;;  %v1994_v19 = vld [vmem:[%s4295_s7 + $0x118] sm:$0xff]  ;;  %v2015_v20 = vld [vmem:[%s4295_s7 + $0x1c0] sm:$0xff] }
 0x40f   : > { %2171 = vmatpush.msrb.mxu3 %v2016_v16  ;;  %v2079_v14 = vld [vmem:[%s4295_s7 + $0x3c0] sm:$0xff]  ;;  %v2046_v16 = vld [vmem:[%s4295_s7 + $0x2b8] sm:$0xff] }
 0x410   : > { %v1850_v22 = vrot.slane %v1843_v21, 7  ;;  %2154 = vmatpush.msrb.mxu2 %v1997_v7  ;;  %v1961_v21 = vld [vmem:[%s4295_s7 + $0x10] sm:$0xff] }
 0x411   : > { %2172 = vmatpush.msrb.mxu3 %v2015_v20 }
 0x412   : > { %v1851_v25 = vsel %vm1039_vm7, %v1849_v53, %v1850_v22  ;;  %2155 = vmatpush.msrb.mxu2 %v1996_v10  ;;  %v1977_v53 = vld [vmem:[%s4295_s7 + $0x90] sm:$0xff]  ;;  %v2047_v10 = vld [vmem:[%s4295_s7 + $0x2c0] sm:$0xff] }
 0x413   : > { %v1857_v26 = vmax.f32 %v1832_v18, %v1851_v25  ;;  %v1978_v18 = vld [vmem:[%s4295_s7 + $0x98] sm:$0xff]  ;;  %v1993_v22 = vld [vmem:[%s4295_s7 + $0x110] sm:$0xff]  ;;  %v1960_v25 = vld [vmem:[%s4295_s7 + $0x8] sm:$0xff] }
 0x414   : > { %2156 = vmatpush.msrb.mxu2 %v1995_v15  ;;  %2137 = vmatpush.msrb.mxu1 %v1978_v18  ;;  %v2030_v15 = vld [vmem:[%s4295_s7 + $0x238] sm:$0xff] }
 0x415   : > { %v1865_v24 = vadd.f32 %v1861_v23, %v1857_v26  ;;  %v2014_v23 = vld [vmem:[%s4295_s7 + $0x1b8] sm:$0xff]  ;;  %v1976_v26 = vld [vmem:[%s4295_s7 + $0x88] sm:$0xff] }
 0x416   : > { %2157 = vmatpush.msrb.mxu2 %v1994_v19  ;;  %2138 = vmatpush.msrb.mxu1 %v1977_v53  ;;  %v2062_v18 = vld [vmem:[%s4295_s7 + $0x338] sm:$0xff]  ;;  %v2045_v53 = vld [vmem:[%s4295_s7 + $0x2b0] sm:$0xff] }
 0x417   : > { %v1867_v27 = vmax.f32 %v1865_v24, 0.0  ;;  %2173 = vmatpush.msrb.mxu3 %v2014_v23  ;;  %v1992_v24 = vld [vmem:[%s4295_s7 + $0x108] sm:$0xff]  ;;  %v2078_v19 = vld [vmem:[%s4295_s7 + $0x3b8] sm:$0xff]  ;;  %v2077_v23 = vld [vmem:[%s4295_s7 + $0x3b0] sm:$0xff] }
 0x418   : > { %2158 = vmatpush.msrb.mxu2 %v1993_v22  ;;  %2139 = vmatpush.msrb.mxu1 %v1976_v26  ;;  %v2061_v22 = vld [vmem:[%s4295_s7 + $0x330] sm:$0xff]  ;;  %v2044_v26 = vld [vmem:[%s4295_s7 + $0x2a8] sm:$0xff] }
 0x419   : > { %1875 = vst [vmem:[#allocation1] sm:$0xff] %v1867_v27  ;;  %v1872_v29 = vsel %vm1039_vm7, %v1867_v27, %v1871_v28  ;;  %v1959_v28 = vld [vmem:[%s4295_s7] sm:$0xff]  ;;  %vm4022_vm7 = vcmp.lt.s32.totalorder %v1058_v41, 176 }
 0x41a   : > { %1874 = vst.msk [vmem:[#allocation4] sm:$0x3] %vm3351_vm10, %v1872_v29  ;;  %v1975_v29 = vld [vmem:[%s4295_s7 + $0x80] sm:$0xff]  ;;  %2159 = vmatpush.msrb.mxu2 %v1992_v24  ;;  %vm1900_vm10 = vmand %vm4004_vm3, %vm4009_vm4  ;;  %v2060_v24 = vld [vmem:[%s4295_s7 + $0x328] sm:$0xff]  ;;  %vm1954_vm3 = vcmp.ge.s32.totalorder %v1058_v41, 72  ;;  %vm1955_vm4 = vcmp.lt.s32.totalorder %v1058_v41, 212 }
 0x41b   : > { %2140 = vmatpush.msrb.mxu1 %v1975_v29  ;;  %vm1914_vm11 = vmand %vm4017_vm5, %vm4022_vm7  ;;  %v2043_v29 = vld [vmem:[%s4295_s7 + $0x2a0] sm:$0xff]  ;;  %vm1937_vm5 = vcmask 490496   ;;  %vm1951_vm7 = vcmask 588800  }
 0x420   : > { %v1878_v30 = vld [vmem:[#allocation1 + $0x1] ss:$9 sm:$0xff] }
 0x421   : > { %1879 = vrot.lane.b32.xlu0 %v1878_v30, %s2773_s21  ;;  %1888 = vst [vmem:[#allocation1] sm:$0xff] %v1867_v27  ;;  %v1991_v30 = vld [vmem:[%s4295_s7 + $0x100] sm:$0xff] }
 0x422   : > { %1889 = vst [vmem:[#allocation1 + $0x9] sm:$0xff] %v1868_v17  ;;  %2160 = vmatpush.msrb.mxu2 %v1991_v30  ;;  %v2059_v30 = vld [vmem:[%s4295_s7 + $0x320] sm:$0xff] }
 0x429   : > { %v1891_v31 = vld [vmem:[#allocation1 + $0x2] ss:$9 sm:$0xff] }
 0x42a   : > { %1892 = vrot.lane.b32.xlu1 %v1891_v31, %s2774_s27  ;;  %1902 = vst [vmem:[#allocation1] sm:$0xff] %v1867_v27  ;;  %v2012_v31 = vld [vmem:[%s4295_s7 + $0x1a8] sm:$0xff]  ;;  %s2728_s27 = scalar_lea.hbm %s4301_s13, 2 }
 0x42b   : > { %1903 = vst [vmem:[#allocation1 + $0x9] sm:$0xff] %v1868_v17 }
 0x432   : > { %v1905_v32 = vld [vmem:[#allocation1 + $0x3] ss:$9 sm:$0xff] }
 0x433   : > { %1906 = vrot.lane.b32.xlu2 %v1905_v32, %s2775_s24  ;;  %1916 = vst [vmem:[#allocation1] sm:$0xff] %v1867_v27  ;;  %v2038_v32 = vld [vmem:[%s4295_s7 + $0x278] sm:$0xff]  ;;  %s2354_s24 = scalar_lea.hbm %s4301_s13, %s2870_s29 }
 0x434   : > { %1917 = vst [vmem:[#allocation1 + $0x9] sm:$0xff] %v1868_v17  ;;  %s2358_s20 = sshll.u32 %s2354_s24, 4  ;;  %s2359_s20 = int_to_ptr.hbm [resolvable:$true] %s2358_s20 }
 0x435   : > { %s2722_s22 = sshra.s32 %s2359_s20, 4  ;;  %s2723_s22 = int_to_ptr.hbm [resolvable:$true] %s2722_s22 }
 0x436   : > { %s2724_s0 = scalar_lea.hbm %s2723_s22, 1  ;;  %p2729_p0 = scmp.lt.s32.totalorder %s2723_s22, %s4301_s13 }
 0x437   : > { %p2725_p11 = scmp.ne.s32.totalorder %s2723_s22, %s2724_s0  ;;  %p2730_p1 = scmp.lt.s32.totalorder %s2728_s27, %s2724_s0 }
 0x439   : > { %p2726_p12 = pnand %p2725_p11, %p2887_p5  ;;  %p2731_p2 = por %p2730_p1, %p2729_p0 }
 0x43b   : > { %v1919_v33 = vld [vmem:[#allocation1 + $0x4] ss:$9 sm:$0xff]  ;;  %p2727_p13 = pneg %p2726_p12 }
 0x43c   : > { %1920 = vrot.lane.b32.xlu0 %v1919_v33, %s2776_s30  ;;  %1930 = vst [vmem:[#allocation1] sm:$0xff] %v1867_v27  ;;  %v2054_v33 = vld [vmem:[%s4295_s7 + $0x2f8] sm:$0xff] }
 0x43d   : > { %1931 = vst [vmem:[#allocation1 + $0x9] sm:$0xff] %v1868_v17  ;;  %2205 = vmatpush.msra.mxu1 %v2054_v33  ;;  %v2042_v33 = vld [vmem:[%s4295_s7 + $0x298] sm:$0xff]  ;;  %p2732_p3 = pnand %p2731_p2, %p2727_p13 }
 0x43f   : > { %2206 = vmatpush.msra.mxu1 %v2053_v38  ;;  %v2073_v38 = vld [vmem:[%s4295_s7 + $0x390] sm:$0xff] }
 0x441   : > { %2207 = vmatpush.msra.mxu1 %v2052_v43  ;;  %v2072_v43 = vld [vmem:[%s4295_s7 + $0x388] sm:$0xff] }
 0x443   : > { %2208 = vmatpush.msra.mxu1 %v2051_v48  ;;  %v2071_v48 = vld [vmem:[%s4295_s7 + $0x380] sm:$0xff] }
 0x444   : > { %v1933_v49 = vld [vmem:[#allocation1 + $0x5] ss:$9 sm:$0xff] }
 0x445   : > { %1934 = vrot.lane.b32.xlu1 %v1933_v49, %s2777_s15  ;;  %1944 = vst [vmem:[#allocation1] sm:$0xff] %v1867_v27  ;;  %v2013_v27 = vld [vmem:[%s4295_s7 + $0x1b0] sm:$0xff]  ;;  %v2070_v49 = vld [vmem:[%s4295_s7 + $0x378] sm:$0xff]  ;;  %2209 = vmatpush.msra.mxu1 %v2050_v57 }
 0x446   : > { %1945 = vst [vmem:[#allocation1 + $0x9] sm:$0xff] %v1868_v17  ;;  %v1962_v17 = vld [vmem:[%s4295_s7 + $0x18] sm:$0xff]  ;;  %2174 = vmatpush.msrb.mxu3 %v2013_v27  ;;  %2225 = vmatpush.msra.mxu2 %v2070_v49  ;;  %v2076_v27 = vld [vmem:[%s4295_s7 + $0x3a8] sm:$0xff] }
 0x447   : > { %2117 = vmatpush.msra.mxu0 %v1962_v17  ;;  %2210 = vmatpush.msra.mxu1 %v2049_v60  ;;  %v2058_v49 = vld [vmem:[%s4295_s7 + $0x318] sm:$0xff] }
 0x448   : > { %2175 = vmatpush.msrb.mxu3 %v2012_v31  ;;  %2226 = vmatpush.msra.mxu2 %v2069_v52  ;;  %v2075_v31 = vld [vmem:[%s4295_s7 + $0x3a0] sm:$0xff]  ;;  %v2024_v52 = vld [vmem:[%s4295_s7 + $0x208] sm:$0xff] }
 0x449   : > { %2118 = vmatpush.msra.mxu0 %v1961_v21  ;;  %2211 = vmatpush.msra.mxu1 %v2048_v5  ;;  %v2029_v21 = vld [vmem:[%s4295_s7 + $0x230] sm:$0xff] }
 0x44a   : > { %2227 = vmatpush.msra.mxu2 %v2068_v45 }
 0x44b   : > { %2119 = vmatpush.msra.mxu0 %v1960_v25  ;;  %2212 = vmatpush.msra.mxu1 %v2047_v10  ;;  %v2028_v25 = vld [vmem:[%s4295_s7 + $0x228] sm:$0xff]  ;;  %v2272_v10 = vld [vmem:[%s4297_s9 + $0x30] sm:$0xff] }
 0x44c   : > { %2228 = vmatpush.msra.mxu2 %v2067_v50 }
 0x44d   : > { %v1947_v34 = vld [vmem:[#allocation1 + $0x6] ss:$9 sm:$0xff]  ;;  %2120 = vmatpush.msra.mxu0 %v1959_v28  ;;  %2213 = vmatpush.msra.mxu1 %v2046_v16 }
 0x44e   : > { %1948 = vrot.lane.b32.xlu2 %v1947_v34, %s2778_s23  ;;  %v2011_v34 = vld [vmem:[%s4295_s7 + $0x1a0] sm:$0xff]  ;;  %2229 = vmatpush.msra.mxu2 %v2066_v59  ;;  %v2267_v16 = vld [vmem:[%s4297_s9 + $0x8] sm:$0xff]  ;;  %s432_s23 = scalar_lea.vmem [#allocation5], %s431_s14 }
 0x44f   : > { %2185 = vmatpush.msrb.mxu0 %v2038_v32  ;;  %2176 = vmatpush.msrb.mxu3 %v2011_v34  ;;  %v2027_v28 = vld [vmem:[%s4295_s7 + $0x220] sm:$0xff]  ;;  %v2026_v32 = vld [vmem:[%s4295_s7 + $0x218] sm:$0xff]  ;;  %s2356_s16 = sshll.u32 %s432_s23, 4  ;;  %s2357_s16 = int_to_ptr.vmem [resolvable:$true] %s2356_s16 }
 0x450   : > { %2230 = vmatpush.msra.mxu2 %v2065_v63  ;;  %2214 = vmatpush.msra.mxu1 %v2045_v53  ;;  %v2074_v34 = vld [vmem:[%s4295_s7 + $0x398] sm:$0xff]  ;;  %v2082_v53 = vld [vmem:[%s4296_s8] sm:$0x1] }
 0x451   : > { %2186 = vmatpush.msrb.mxu0 %v2037_v37  ;;  %2177 = vmatpush.msrb.mxu3 %v2010_v39  ;;  %v2057_v37 = vld [vmem:[%s4295_s7 + $0x310] sm:$0xff]  ;;  %v2040_v39 = vld [vmem:[%s4295_s7 + $0x288] sm:$0xff] }
 0x452   : > { %2231 = vmatpush.msra.mxu2 %v2064_v6  ;;  %2215 = vmatpush.msra.mxu1 %v2044_v26 }
 0x453   : > { %2187 = vmatpush.msrb.mxu0 %v2036_v42  ;;  %2178 = vmatpush.msrb.mxu3 %v2009_v46  ;;  %v2056_v42 = vld [vmem:[%s4295_s7 + $0x308] sm:$0xff]  ;;  %v2023_v46 = vld [vmem:[%s4295_s7 + $0x200] sm:$0xff] }
 0x454   : > { %2232 = vmatpush.msra.mxu2 %v2063_v13  ;;  %2216 = vmatpush.msra.mxu1 %v2043_v29  ;;  %v2270_v13 = vld [vmem:[%s4297_s9 + $0x20] sm:$0xff] }
 0x455   : > { %2188 = vmatpush.msrb.mxu0 %v2035_v47  ;;  %2179 = vmatpush.msrb.mxu3 %v2008_v51  ;;  %v2055_v47 = vld [vmem:[%s4295_s7 + $0x300] sm:$0xff] }
 0x456   : > { %2233 = vmatpush.msra.mxu2 %v2062_v18  ;;  %2217 = vmatpush.msra.mxu1 %v2042_v33  ;;  %v2314_v18 = vld [vmem:[%s4299_s11 + $0x30] sm:$0x3] }
 0x457   : > { %2189 = vmatpush.msrb.mxu0 %v2034_v56  ;;  %2180 = vmatpush.msrb.mxu3 %v2007_v12 }
 0x458   : > { %2234 = vmatpush.msra.mxu2 %v2061_v22  ;;  %2218 = vmatpush.msra.mxu1 %v2041_v36 }
 0x459   : > { %2190 = vmatpush.msrb.mxu0 %v2033_v58  ;;  %2647 = vmatpush.msk.msra.mxu3 %vm497_vm0, %v2081_v2 }
 0x45a   : > { %2235 = vmatpush.msra.mxu2 %v2060_v24  ;;  %2219 = vmatpush.msra.mxu1 %v2040_v39  ;;  %v2308_v39 = vld [vmem:[%s4299_s11] sm:$0xff] }
 0x45b   : > { %2191 = vmatpush.msrb.mxu0 %v2032_v4  ;;  %2251 = vmatpush.msra.mxu3 %v2080_v9  ;;  %v2274_v9 = vld [vmem:[%s4297_s9 + $0x40] sm:$0xff] }
 0x45c   : > { %2236 = vmatpush.msra.mxu2 %v2059_v30 }
 0x45d   : > { %2192 = vmatpush.msrb.mxu0 %v2031_v61  ;;  %2252 = vmatpush.msra.mxu3 %v2079_v14  ;;  %v2273_v61 = vld [vmem:[%s4297_s9 + $0x38] sm:$0xff] }
 0x45e   : > { %2237 = vmatpush.msra.mxu2 %v2058_v49  ;;  %v2269_v14 = vld [vmem:[%s4297_s9 + $0x18] sm:$0xff] }
 0x45f   : > { %2193 = vmatpush.msrb.mxu0 %v2030_v15  ;;  %2253 = vmatpush.msra.mxu3 %v2078_v19  ;;  %v2268_v15 = vld [vmem:[%s4297_s9 + $0x10] sm:$0xff]  ;;  %v2313_v19 = vld [vmem:[%s4299_s11 + $0x28] sm:$0xff] }
 0x460   : > { %2238 = vmatpush.msra.mxu2 %v2057_v37 }
 0x461   : > { %2194 = vmatpush.msrb.mxu0 %v2029_v21  ;;  %2254 = vmatpush.msra.mxu3 %v2077_v23  ;;  %v2311_v21 = vld [vmem:[%s4299_s11 + $0x18] sm:$0xff] }
 0x462   : > { %2239 = vmatpush.msra.mxu2 %v2056_v42  ;;  %v2279_v42 = vld [vmem:[%s4298_s10] sm:$0x1] }
 0x463   : > { %2195 = vmatpush.msrb.mxu0 %v2028_v25  ;;  %2255 = vmatpush.msra.mxu3 %v2076_v27 }
 0x464   : > { %2240 = vmatpush.msra.mxu2 %v2055_v47 }
 0x465   : > { %2196 = vmatpush.msrb.mxu0 %v2027_v28  ;;  %2256 = vmatpush.msra.mxu3 %v2075_v31 }
 0x467   : > { %2197 = vmatpush.msrb.mxu0 %v2026_v32  ;;  %2257 = vmatpush.msra.mxu3 %v2074_v34 }
 0x469   : > { %2198 = vmatpush.msrb.mxu0 %v2025_v35  ;;  %2258 = vmatpush.msra.mxu3 %v2073_v38  ;;  %v2310_v38 = vld [vmem:[%s4299_s11 + $0x10] sm:$0xff] }
 0x46b   : > { %2199 = vmatpush.msrb.mxu0 %v2024_v52  ;;  %2259 = vmatpush.msra.mxu3 %v2072_v43  ;;  %v2309_v52 = vld [vmem:[%s4299_s11 + $0x8] sm:$0xff] }
 0x46d   : > { %2200 = vmatpush.msrb.mxu0 %v2023_v46  ;;  %2260 = vmatpush.msra.mxu3 %v2071_v48  ;;  %v2315_v46 = vld [vmem:[%s4300_s12] sm:$0x1] }
 0x48d   : > { %v1907_v62 = vpop.permute.xlu2 %1906 }
 0x48e   : > { %v1908_v7 = vrot.slane %v1907_v62, 7 }
 0x490   : > { %v1910_v20 = vsel %vm1909_vm9, %v1908_v7, %v1907_v62  ;;  %vm1956_vm9 = vmand %vm1954_vm3, %vm1955_vm4  ;;  %v2276_v7 = vld [vmem:[%s4297_s9 + $0x50] sm:$0xff] }
 0x493   : > { %v1880_v44 = vpop.permute.xlu0 %1879 }
 0x494   : > { %v1881_v40 = vrot.slane %v1880_v44, 7 }
 0x496   : > { %v1882_v55 = vsel %vm1202_vm12, %v1881_v40, %v1880_v44  ;;  %vm4156_vm12 = vcmp.ge.s32.totalorder %v1058_v41, 48  ;;  %v2039_v40 = vld [vmem:[%s4295_s7 + $0x280] sm:$0xff] }
 0x497   : > { %1887 = vst.msk [vmem:[#allocation4 + $0x1] sm:$0x3] %vm1886_vm2, %v1882_v55  ;;  %vm1928_vm15 = vmand %vm4156_vm12, %vm4161_vm13  ;;  %2220 = vmatpush.msra.mxu1 %v2039_v40  ;;  %vm1941_vm2 = vcmp.lt.s32.totalorder %v1058_v41, 200  ;;  %v2278_v41 = vld [vmem:[%s4297_s9 + $0x60] sm:$0xf] }
 0x49c   : > { %v1893_v8 = vpop.permute.xlu1 %1892 }
 0x49d   : > { %v1894_v11 = vrot.slane %v1893_v8, 7 }
 0x49f   : > { %v1896_v17 = vsel %vm1895_vm8, %v1894_v11, %v1893_v8  ;;  %vm1942_vm8 = vmand %vm1940_vm1, %vm1941_vm2  ;;  %v2275_v8 = vld [vmem:[%s4297_s9 + $0x48] sm:$0xff] }
 0x4a0   : > { %1901 = vst.msk [vmem:[#allocation4 + $0x2] sm:$0x3] %vm1900_vm10, %v1896_v17  ;;  %vm2099_vm10 = vcmask 687104   ;;  %v2271_v11 = vld [vmem:[%s4297_s9 + $0x28] sm:$0xff]  ;;  %v2266_v17 = vld [vmem:[%s4297_s9] sm:$0xff] }
 0x4a1   : > { %1915 = vst.msk [vmem:[#allocation4 + $0x3] sm:$0x3] %vm1914_vm11, %v1910_v20  ;;  %v2312_v20 = vld [vmem:[%s4299_s11 + $0x20] sm:$0xff]  ;;  %vm2343_vm11 = vcmask 57344  }
 0x4a8   : > { %v1949_v56 = vpop.permute.xlu2 %1948 }
 0x4a9   : > { %v1950_v57 = vrot.slane %v1949_v56, 7 }
 0x4ab   : > { %v1952_v58 = vsel %vm1951_vm7, %v1950_v57, %v1949_v56 }
 0x4ae   : > { %v1921_v50 = vpop.permute.xlu0 %1920 }
 0x4af   : > { %v1922_v51 = vrot.slane %v1921_v50, 7 }
 0x4b1   : > { %v1924_v55 = vsel %vm1923_vm14, %v1922_v51, %v1921_v50 }
 0x4b2   : > { %1929 = vst.msk [vmem:[#allocation4 + $0x4] sm:$0x3] %vm1928_vm15, %v1924_v55 }
 0x4b7   : > { %v1935_v59 = vpop.permute.xlu1 %1934 }
 0x4b8   : > { %v1936_v12 = vrot.slane %v1935_v59, 7 }
 0x4ba   : > { %v1938_v62 = vsel %vm1937_vm5, %v1936_v12, %v1935_v59 }
 0x4bb   : > { %1943 = vst.msk [vmem:[#allocation4 + $0x5] sm:$0x3] %vm1942_vm8, %v1938_v62 }
 0x4bc   : > { %1957 = vst.msk [vmem:[#allocation4 + $0x6] sm:$0x3] %vm1956_vm9, %v1952_v58 }
 0x4c3   : > { %v1958_v60 = vld [vmem:[#allocation4] sm:$0xff] }
 0x4c4   : > { %v2084_v63 = vperm.slane %v1958_v60, 0  ;;  %v2085_v0 = vperm.slane %v1958_v60, 1  ;;  %v2086_v1 = vperm.slane %v1958_v60, 2  ;;  %v2087_v2 = vperm.slane %v1958_v60, 3 }
 0x4c5   : > { %v2088_v54 = vperm.slane %v1958_v60, 4  ;;  %v2089_v4 = vperm.slane %v1958_v60, 5  ;;  %v2090_v5 = vperm.slane %v1958_v60, 6  ;;  %v2091_v6 = vperm.slane %v1958_v60, 7 }
 0x4c6   : > { %2121 = vmatmul.f32.vlgmr.msra.gmra.mxu0 %v2084_v63  ;;  %2141 = vmatmul.f32.vlgmr.msrb.gmra.mxu1 %v2085_v0 }
 0x4c7   : > { %2161 = vmatmul.f32.vlgmr.msrb.gmra.mxu2 %v2086_v1  ;;  %2181 = vmatmul.f32.vlgmr.msrb.gmra.mxu3 %v2087_v2 }
 0x4c8   : > { %2649 = vmatpush.msk.msrb.mxu3 %vm497_vm0, %v2278_v41  ;;  %2651 = vmatpush.msk.msra.mxu0 %vm1002_vm6, %v2314_v18  ;;  %vm2280_vm0 = vcmask 818176   ;;  %vm2316_vm6 = vcmask 408576  }
 0x4ca   : > { %2291 = vmatpush.msrb.mxu3 %v2277_v3  ;;  %2333 = vmatpush.msra.mxu0 %v2313_v19 }
 0x4cc   : > { %2292 = vmatpush.msrb.mxu3 %v2276_v7  ;;  %2334 = vmatpush.msra.mxu0 %v2312_v20 }
 0x4ce   : > { %2201 = vmatmul.f32.vlgmr.msrb.gmra.mxu0 %v2088_v54  ;;  %2221 = vmatmul.f32.vlgmr.msra.gmra.mxu1 %v2089_v4 }
 0x4cf   : > { %2241 = vmatmul.f32.vlgmr.msra.gmra.mxu2 %v2090_v5  ;;  %2648 = vmatmul.msk.f32.vlgmr.msra.gmra.mxu3 %vm2099_vm10, %v2091_v6 }
 0x4d0   : > { %2293 = vmatpush.msrb.mxu3 %v2275_v8  ;;  %2335 = vmatpush.msra.mxu0 %v2311_v21 }
 0x4d2   : > { %2294 = vmatpush.msrb.mxu3 %v2274_v9  ;;  %2336 = vmatpush.msra.mxu0 %v2310_v38 }
 0x4d4   : > { %2295 = vmatpush.msrb.mxu3 %v2273_v61  ;;  %2337 = vmatpush.msra.mxu0 %v2309_v52 }
 0x4d6   : > { %2296 = vmatpush.msrb.mxu3 %v2272_v10  ;;  %2338 = vmatpush.msra.mxu0 %v2308_v39 }
 0x4d8   : > { %2297 = vmatpush.msrb.mxu3 %v2271_v11 }
 0x4da   : > { %2298 = vmatpush.msrb.mxu3 %v2270_v13 }
 0x4dc   : > { %2299 = vmatpush.msrb.mxu3 %v2269_v14 }
 0x4de   : > { %2300 = vmatpush.msrb.mxu3 %v2268_v15 }
 0x4e0   : > { %2301 = vmatpush.msrb.mxu3 %v2267_v16 }
 0x4e2   : > { %2302 = vmatpush.msrb.mxu3 %v2266_v17 }
 0x543   : > { %v2122_v22 = vpop.f32.mrf.mxu0  ;;  %v2142_v25 = vpop.f32.mrf.mxu1 }
 0x544   : > { %v2123_v23 = vadd.f32 %v2122_v22, %v2082_v53 }
 0x546   : > { %v2143_v26 = vadd.f32 %v2142_v25, %v2123_v23 }
 0x54a   : > { %v2162_v24 = vpop.f32.mrf.mxu2  ;;  %v2182_v27 = vpop.f32.mrf.mxu3 }
 0x54b   : > { %v2163_v28 = vadd.f32 %v2162_v24, %v2143_v26  ;;  %v2202_v30 = vpop.f32.mrf.mxu0  ;;  %v2222_v32 = vpop.f32.mrf.mxu1 }
 0x54d   : > { %v2183_v29 = vadd.f32 %v2182_v27, %v2163_v28 }
 0x54f   : > { %v2203_v31 = vadd.f32 %v2202_v30, %v2183_v29 }
 0x551   : > { %v2223_v33 = vadd.f32 %v2222_v32, %v2203_v31 }
 0x552   : > { %v2242_v49 = vpop.f32.mrf.mxu2  ;;  %v2262_v35 = vpop.f32.mrf.mxu3 }
 0x553   : > { %v2243_v34 = vadd.f32 %v2242_v49, %v2223_v33 }
 0x555   : > { %v2263_v36 = vadd.f32 %v2262_v35, %v2243_v34 }
 0x557   : > { %v2265_v37 = vmax.f32 %v2263_v36, 0.0 }
 0x559   : > { %2650 = vmatmul.msk.f32.vlgmr.msrb.gmra.mxu3 %vm2280_vm0, %v2265_v37 }
 0x5dc   : > { %v2304_v43 = vpop.f32.mrf.mxu3 }
 0x5dd   : > { %v2305_v44 = vadd.f32 %v2304_v43, %v2279_v42 }
 0x5df   : > { %v2307_v45 = vmax.f32 %v2305_v44, 0.0 }
 0x5e1   : > { %2652 = vmatmul.msk.f32.vlgmr.msra.gmra.mxu0 %vm2316_vm6, %v2307_v45 }
 0x65e   : > { %v2340_v40 = vpop.f32.mrf.mxu0 }
 0x65f   : > { %v2341_v47 = vadd.f32 %v2340_v40, %v2315_v46 }
 0x661   : > { %2344 = vst.msk [vmem:[%s432_s23] sm:$0x1] %vm2343_vm11, %v2341_v47 }
 0x662   : > { %2735 = shalt.err (!%p2732_p3)
}
 0x663   : > { %2662 = dma.vmem_to_hbm [thread:$0]  (%p2887_p5), %s2357_s16, 16, %s2359_s20, %s2346_s17  }
 0x664 PF: > { %p2668_p4 = scmp.ge.s32.totalorder %s2770_s28, 2  ;;  %s2370_s14 = sand.u32 1, %s2758_s25  }
 0x665   : > { %s2371_s15 = scalar_lea.sflag [#allocation6], %s2370_s14 }
 0x666   : > { %p2665_p7 = pnand %p2668_p4, %p2891_p6 }
 0x668   : > { %p2666_p8 = pneg %p2665_p7 }
 0x66a   : > { %2753 = dma.done.wait (%p2666_p8), %s2371_s15, 16  }
 0x66b   : > { %2755 = vsyncadd (%p2666_p8), %s2371_s15, 4294967280  ;;  %s4330_s28 = sld [smem:[#allocation9_spill]]  ;;  %s4333_s25 = smov %s2762_s26 }
 0x66c   : > { %s4331_s0 = sld [smem:[#allocation8_spill]] }
 0x66d   : > { %s4332_s27 = sld [smem:[#allocation10_spill]] }
 0x671   : > { %p23_p9 = scmp.ge.s32.totalorder %s4330_s28, 4  }
 0x672   : > { %s4334_s26 = smov %s4331_s0 }
 0x673   :  { %25 = sbr.rel (!%p23_p9) target bundleno = 5 (0x5), region = 119 }
 0x678   :  { %2376 = vsyncpa [#allocation6], 1 }
 0x679   :  { %2378 = vsyncpa [#allocation6 + $0x1], 1 }

</bundles_post_ra>
